<compile_context>
chip_gen: v5e
topology: v5e:2x2
jax: 0.10.0
libtpu: 0.0.40
codegen_flags: <defaults>
</compile_context>

<pallas_src>
import jax
import jax.numpy as jnp
from jax import lax
from jax.experimental import pallas as pl
from jax.experimental.pallas import tpu as pltpu


# ------------------------------ helpers ------------------------------------ #
def _round_up(x, m):
    return (x + m - 1) // m * m


S_DIM = 201       # state feature count (130 head + 71 tail)
S_HEAD = 130
S_TAIL = 71
D1 = 256          # q1 hidden widths
D2 = 128
H_PAD = 128       # 72 / 64 hidden widths padded to a lane multiple
TB_CAP = 2048     # max batch-tile rows


# ----------------------------- Pallas kernel ------------------------------- #
def qnetwork_kernel(xin_ref,
                    w1x_ref, b1x_ref, w2x_ref, b2x_ref,
                    w1sa_ref, w1hx_ref, b1_ref,
                    w2_ref, b2_ref, w3_ref, b3_ref,
                    w4_ref, b4_ref,
                    out_ref):
    f32 = jnp.float32
    x = xin_ref[...]                                   # (TB, K_IN) bf16

    # q1_x branch: Linear(71,72) -> Tanh -> Linear(72,64) -> (outer) Tanh.
    # w1x rows 130..200 hold the real weights, everything else is zero, so the
    # full padded input can be used directly (implicit state[:,130:] slice).
    h = jnp.tanh(jnp.dot(x, w1x_ref[...], preferred_element_type=f32)
                 + b1x_ref[...])                                        # (TB,128)
    hx = jnp.tanh(jnp.dot(h.astype(jnp.bfloat16), w2x_ref[...],
                          preferred_element_type=f32) + b2x_ref[...])   # (TB,128)

    # q1 layer 1 on implicit concat([state_head, hx, action]):
    # w1sa holds head rows at 0..129 and action rows at 201.., with zeros under
    # the state-tail lanes; the hx contribution comes from a second small dot.
    z1 = (jnp.dot(x, w1sa_ref[...], preferred_element_type=f32)
          + jnp.dot(hx.astype(jnp.bfloat16), w1hx_ref[...],
                    preferred_element_type=f32)
          + b1_ref[...])                                                # (TB,256)
    h1 = jnp.tanh(z1)
    h2 = jnp.tanh(jnp.dot(h1.astype(jnp.bfloat16), w2_ref[...],
                          preferred_element_type=f32) + b2_ref[...])    # (TB,128)
    h3 = jnp.tanh(jnp.dot(h2.astype(jnp.bfloat16), w3_ref[...],
                          preferred_element_type=f32) + b3_ref[...])    # (TB,128)

    # Final Linear(64,1) on the VPU (lane reduce, no N=1 MXU pass).
    res = (jnp.sum(h3 * w4_ref[...], axis=-1, keepdims=True)
           + b4_ref[...])                                               # (TB,1)

    # Lane-pack (TB,1) -> (TB//128, 128) without a sublane->lane relayout:
    # per 128-row slab, build diag(res_slab) and cross-sublane reduce it.
    ii = lax.broadcasted_iota(jnp.int32, (128, 128), 0)
    jj = lax.broadcasted_iota(jnp.int32, (128, 128), 1)
    eye = (ii == jj).astype(f32)                                        # (128,128)
    g = out_ref.shape[0]
    rows = []
    for c in range(g):                                  # g is small & static
        slab = res[c * 128:(c + 1) * 128, :] * eye      # (128,128) diagonal
        rows.append(jnp.sum(slab, axis=0, keepdims=True))   # (1,128)
    out_ref[...] = jnp.concatenate(rows, axis=0)            # (g,128)


# ------------------------------- wrapper ------------------------------------ #
def qnetwork_forward(state, action, packed, num_actions):
    B = state.shape[0]
    A = num_actions
    K_IN = _round_up(S_DIM + A, 128)

    # Batch tiling: multiple of 128 (for output packing & bf16 tiles), as large
    # as possible up to TB_CAP, but guaranteeing >= 2 grid steps when the batch
    # allows it (so "parallel" can shard across v7x's two TensorCores).
    b128 = _round_up(B, 128)
    if b128 <= 128:
        TB = 128
    else:
        TB = min(TB_CAP, _round_up(pl.cdiv(b128, 2), 128))
    B_pad = _round_up(B, TB)
    G = TB // 128
    n_step = B_pad // TB

    # Single fused host-side repack: cast bf16 + concat action + zero-pad
    # (batch rows and lanes).  No separate head/tail split of the state.
    xa = jnp.concatenate([state.astype(jnp.bfloat16),
                          action.astype(jnp.bfloat16)], axis=1)   # (B, 201+A)
    xin = jnp.pad(xa, ((0, B_pad - B), (0, K_IN - xa.shape[1])))  # (B_pad, K_IN)

    def const(shape):
        nd = len(shape)
        return pl.BlockSpec(shape, lambda i, _nd=nd: (0,) * _nd)

    in_specs = [
        pl.BlockSpec((TB, K_IN), lambda i: (i, 0)),            # xin
        const((K_IN, H_PAD)), const((1, H_PAD)),               # w1x, b1x
        const((H_PAD, H_PAD)), const((1, H_PAD)),              # w2x, b2x
        const((K_IN, D1)), const((H_PAD, D1)), const((1, D1)),  # w1sa, w1hx, b1
        const((D1, D2)), const((1, D2)),                        # w2, b2
        const((D2, H_PAD)), const((1, H_PAD)),                  # w3, b3
        const((1, H_PAD)), const((1, 1)),                       # w4_row, b4
    ]

    out = pl.pallas_call(
        qnetwork_kernel,
        out_shape=jax.ShapeDtypeStruct((n_step, G, 128), jnp.float32),
        grid=(n_step,),
        in_specs=in_specs,
        out_specs=pl.BlockSpec((None, G, 128), lambda i: (i, 0, 0)),
        compiler_params=pltpu.CompilerParams(
            dimension_semantics=("parallel",),
            vmem_limit_bytes=32 * 1024 * 1024),
    )(xin,
      packed["w1x"], packed["b1x"], packed["w2x"], packed["b2x"],
      packed["w1sa"], packed["w1hx"], packed["b1"],
      packed["w2"], packed["b2"], packed["w3"], packed["b3"],
      packed["w4"], packed["b4"])

    # (n_step, G, 128) row-major == batch order; slice off padded rows.
    return out.reshape(-1)[:B].reshape(B, 1)


# --------------------------- parameter init --------------------------------- #
def xavier_uniform(key, fan_in, fan_out):
    # torch.nn.init.xavier_uniform_(gain=1): U(-b, b), b = sqrt(6/(fan_in+fan_out))
    bound = (6.0 / (fan_in + fan_out)) ** 0.5
    return jax.random.uniform(key, (fan_in, fan_out), jnp.float32, -bound, bound)


def init_params(key, num_actions):
    """Raw f32 params (weights stored [in, out]); biases zero per weights_init_."""
    ks = jax.random.split(key, 6)
    zeros = lambda n: jnp.zeros((1, n), jnp.float32)
    return {
        "w1x": xavier_uniform(ks[0], 71, 72), "b1x": zeros(72),
        "w2x": xavier_uniform(ks[1], 72, 64), "b2x": zeros(64),
        "w1": xavier_uniform(ks[2], 194 + num_actions, 256), "b1": zeros(256),
        "w2": xavier_uniform(ks[3], 256, 128), "b2": zeros(128),
        "w3": xavier_uniform(ks[4], 128, 64), "b3": zeros(64),
        "w4": xavier_uniform(ks[5], 64, 1), "b4": zeros(1),
    }


def pack_params(raw, num_actions):
    """Row-place / zero-pad weights to lane multiples, cast to bf16.

    Input lane layout seen by the kernel: [state(201) | action(A) | pad].
    """
    A = num_actions
    K_IN = _round_up(S_DIM + A, 128)

    def w_place(w, rows, cols, row_off=0):
        out = jnp.zeros((rows, cols), jnp.float32)
        out = out.at[row_off:row_off + w.shape[0], :w.shape[1]].set(w)
        return out.astype(jnp.bfloat16)

    def b_pad(b, cols):
        return jnp.pad(b, ((0, 0), (0, cols - b.shape[1]))).astype(jnp.float32)

    w1 = raw["w1"]  # (194+A, 256): rows = [head 0..129 | hx 130..193 | action 194..]
    w1sa = jnp.zeros((K_IN, D1), jnp.float32)
    w1sa = w1sa.at[:S_HEAD, :].set(w1[:S_HEAD])                       # head rows
    w1sa = w1sa.at[S_DIM:S_DIM + A, :].set(w1[S_HEAD + 64:])          # action rows
    w1hx = jnp.zeros((H_PAD, D1), jnp.float32)
    w1hx = w1hx.at[:64, :].set(w1[S_HEAD:S_HEAD + 64])                # hx rows

    return {
        # q1_x branch: weights live under the state-tail lanes (130..200).
        "w1x": w_place(raw["w1x"], K_IN, H_PAD, row_off=S_HEAD),
        "b1x": b_pad(raw["b1x"], H_PAD),
        "w2x": w_place(raw["w2x"], H_PAD, H_PAD),
        "b2x": b_pad(raw["b2x"], H_PAD),
        # q1 layer 1, split as (state+action) rows and hx rows.
        "w1sa": w1sa.astype(jnp.bfloat16),
        "w1hx": w1hx.astype(jnp.bfloat16),
        "b1": raw["b1"].astype(jnp.float32),
        "w2": raw["w2"].astype(jnp.bfloat16),
        "b2": raw["b2"].astype(jnp.float32),
        "w3": w_place(raw["w3"], D2, H_PAD),
        "b3": b_pad(raw["b3"], H_PAD),
        # Final layer stays f32: used on the VPU (multiply + lane reduce).
        "w4": jnp.pad(raw["w4"].T, ((0, 0), (0, H_PAD - 64))).astype(jnp.float32),
        "b4": raw["b4"].astype(jnp.float32),   # (1,1)
    }


# -------------------------- pure-JAX reference ------------------------------ #
def qnetwork_reference(state, action, raw):
    s = state.astype(jnp.float32)
    a = action.astype(jnp.float32)
    h = jnp.tanh(s[:, S_HEAD:] @ raw["w1x"] + raw["b1x"])
    hx = jnp.tanh(h @ raw["w2x"] + raw["b2x"])
    x = jnp.concatenate([s[:, :S_HEAD], hx, a], axis=1)
    h1 = jnp.tanh(x @ raw["w1"] + raw["b1"])
    h2 = jnp.tanh(h1 @ raw["w2"] + raw["b2"])
    h3 = jnp.tanh(h2 @ raw["w3"] + raw["b3"])
    return h3 @ raw["w4"] + raw["b4"]


if __name__ == "__main__":
    num_actions = 4
    key = jax.random.PRNGKey(0)
    kp, ks1, ka1, ks2, ka2 = jax.random.split(key, 5)

    raw = init_params(kp, num_actions)
    packed = pack_params(raw, num_actions)

    # Case 1: tiny batch (single grid step, padded batch rows).
    B1 = 8
    state1 = jax.random.normal(ks1, (B1, S_DIM), jnp.float32)
    action1 = jax.random.normal(ka1, (B1, num_actions), jnp.float32)
    out1 = jax.block_until_ready(qnetwork_forward(state1, action1, packed, num_actions))
    ref1 = qnetwork_reference(state1, action1, raw)
    assert out1.shape == (B1, 1)
    assert jnp.allclose(out1, ref1, atol=5e-2, rtol=5e-2), "mismatch (B=8)"

    # Case 2: multi-grid-step path (B > TB and B not a multiple of TB).
    B2 = 200
    state2 = jax.random.normal(ks2, (B2, S_DIM), jnp.float32)
    action2 = jax.random.normal(ka2, (B2, num_actions), jnp.float32)
    out2 = jax.block_until_ready(qnetwork_forward(state2, action2, packed, num_actions))
    ref2 = qnetwork_reference(state2, action2, raw)
    assert out2.shape == (B2, 1)
    assert jnp.allclose(out2, ref2, atol=5e-2, rtol=5e-2), "mismatch (B=200)"

    print("KERNEL_OK")
</pallas_src>

<mosaic_0001>
module attributes {stable_mosaic.version = 11 : i64} {
  func.func @qnetwork_kernel(%arg0: i32, %arg1: memref<128x256xbf16, #tpu.memory_space<vmem>>, %arg2: memref<256x128xbf16, #tpu.memory_space<vmem>>, %arg3: memref<1x128xf32, #tpu.memory_space<vmem>>, %arg4: memref<128x128xbf16, #tpu.memory_space<vmem>>, %arg5: memref<1x128xf32, #tpu.memory_space<vmem>>, %arg6: memref<256x256xbf16, #tpu.memory_space<vmem>>, %arg7: memref<128x256xbf16, #tpu.memory_space<vmem>>, %arg8: memref<1x256xf32, #tpu.memory_space<vmem>>, %arg9: memref<256x128xbf16, #tpu.memory_space<vmem>>, %arg10: memref<1x128xf32, #tpu.memory_space<vmem>>, %arg11: memref<128x128xbf16, #tpu.memory_space<vmem>>, %arg12: memref<1x128xf32, #tpu.memory_space<vmem>>, %arg13: memref<1x128xf32, #tpu.memory_space<vmem>>, %arg14: memref<1x1xf32, #tpu.memory_space<vmem>>, %arg15: memref<1x1x128xf32, #tpu.memory_space<vmem>>) attributes {dimension_semantics = [#tpu.dimension_semantics<parallel>], iteration_bounds = array<i64: 1>, scalar_prefetch = 0 : i64, scratch_operands = 0 : i64, tpu.core_type = #tpu.core_type<tc>, window_params = [{transform_indices = @transform_0, window_bounds = array<i64: 128, 256>}, {pipeline_mode = #tpu.pipeline_mode<synchronous>, transform_indices = @transform_1, window_bounds = array<i64: 256, 128>}, {pipeline_mode = #tpu.pipeline_mode<synchronous>, transform_indices = @transform_2, window_bounds = array<i64: 1, 128>}, {pipeline_mode = #tpu.pipeline_mode<synchronous>, transform_indices = @transform_3, window_bounds = array<i64: 128, 128>}, {pipeline_mode = #tpu.pipeline_mode<synchronous>, transform_indices = @transform_4, window_bounds = array<i64: 1, 128>}, {pipeline_mode = #tpu.pipeline_mode<synchronous>, transform_indices = @transform_5, window_bounds = array<i64: 256, 256>}, {pipeline_mode = #tpu.pipeline_mode<synchronous>, transform_indices = @transform_6, window_bounds = array<i64: 128, 256>}, {pipeline_mode = #tpu.pipeline_mode<synchronous>, transform_indices = @transform_7, window_bounds = array<i64: 1, 256>}, {pipeline_mode = #tpu.pipeline_mode<synchronous>, transform_indices = @transform_8, window_bounds = array<i64: 256, 128>}, {pipeline_mode = #tpu.pipeline_mode<synchronous>, transform_indices = @transform_9, window_bounds = array<i64: 1, 128>}, {pipeline_mode = #tpu.pipeline_mode<synchronous>, transform_indices = @transform_10, window_bounds = array<i64: 128, 128>}, {pipeline_mode = #tpu.pipeline_mode<synchronous>, transform_indices = @transform_11, window_bounds = array<i64: 1, 128>}, {pipeline_mode = #tpu.pipeline_mode<synchronous>, transform_indices = @transform_12, window_bounds = array<i64: 1, 128>}, {pipeline_mode = #tpu.pipeline_mode<synchronous>, transform_indices = @transform_13, window_bounds = array<i64: 1, 1>}, {transform_indices = @transform_14, window_bounds = array<i64: 1, 1, 128>}]} {
    %c0 = arith.constant 0 : index
    %c0_0 = arith.constant 0 : index
    %0 = vector.load %arg1[%c0, %c0_0] : memref<128x256xbf16, #tpu.memory_space<vmem>>, vector<128x256xbf16>
    %c0_1 = arith.constant 0 : index
    %c0_2 = arith.constant 0 : index
    %1 = vector.load %arg2[%c0_1, %c0_2] : memref<256x128xbf16, #tpu.memory_space<vmem>>, vector<256x128xbf16>
    %cst = arith.constant dense<0.000000e+00> : vector<128x128xf32>
    %2 = tpu.matmul %0, %1, %cst {dimension_numbers = #tpu.dot_dimension_numbers<[1], [0], [0], [1], [0, 0, 1, 1], [], []>} : vector<128x256xbf16>, vector<256x128xbf16>, vector<128x128xf32> -> vector<128x128xf32>
    %c0_3 = arith.constant 0 : index
    %c0_4 = arith.constant 0 : index
    %3 = vector.load %arg3[%c0_3, %c0_4] : memref<1x128xf32, #tpu.memory_space<vmem>>, vector<1x128xf32>
    %4 = vector.broadcast %3 : vector<1x128xf32> to vector<128x128xf32>
    %5 = arith.addf %2, %4 : vector<128x128xf32>
    %6 = math.tanh %5 : vector<128x128xf32>
    %7 = arith.truncf %6 : vector<128x128xf32> to vector<128x128xbf16>
    %c0_5 = arith.constant 0 : index
    %c0_6 = arith.constant 0 : index
    %8 = vector.load %arg4[%c0_5, %c0_6] : memref<128x128xbf16, #tpu.memory_space<vmem>>, vector<128x128xbf16>
    %cst_7 = arith.constant dense<0.000000e+00> : vector<128x128xf32>
    %9 = tpu.matmul %7, %8, %cst_7 {dimension_numbers = #tpu.dot_dimension_numbers<[1], [0], [0], [1], [0, 0, 1, 1], [], []>} : vector<128x128xbf16>, vector<128x128xbf16>, vector<128x128xf32> -> vector<128x128xf32>
    %c0_8 = arith.constant 0 : index
    %c0_9 = arith.constant 0 : index
    %10 = vector.load %arg5[%c0_8, %c0_9] : memref<1x128xf32, #tpu.memory_space<vmem>>, vector<1x128xf32>
    %11 = vector.broadcast %10 : vector<1x128xf32> to vector<128x128xf32>
    %12 = arith.addf %9, %11 : vector<128x128xf32>
    %13 = math.tanh %12 : vector<128x128xf32>
    %c0_10 = arith.constant 0 : index
    %c0_11 = arith.constant 0 : index
    %14 = vector.load %arg6[%c0_10, %c0_11] : memref<256x256xbf16, #tpu.memory_space<vmem>>, vector<256x256xbf16>
    %cst_12 = arith.constant dense<0.000000e+00> : vector<128x256xf32>
    %15 = tpu.matmul %0, %14, %cst_12 {dimension_numbers = #tpu.dot_dimension_numbers<[1], [0], [0], [1], [0, 0, 1, 1], [], []>} : vector<128x256xbf16>, vector<256x256xbf16>, vector<128x256xf32> -> vector<128x256xf32>
    %16 = arith.truncf %13 : vector<128x128xf32> to vector<128x128xbf16>
    %c0_13 = arith.constant 0 : index
    %c0_14 = arith.constant 0 : index
    %17 = vector.load %arg7[%c0_13, %c0_14] : memref<128x256xbf16, #tpu.memory_space<vmem>>, vector<128x256xbf16>
    %cst_15 = arith.constant dense<0.000000e+00> : vector<128x256xf32>
    %18 = tpu.matmul %16, %17, %cst_15 {dimension_numbers = #tpu.dot_dimension_numbers<[1], [0], [0], [1], [0, 0, 1, 1], [], []>} : vector<128x128xbf16>, vector<128x256xbf16>, vector<128x256xf32> -> vector<128x256xf32>
    %19 = arith.addf %15, %18 : vector<128x256xf32>
    %c0_16 = arith.constant 0 : index
    %c0_17 = arith.constant 0 : index
    %20 = vector.load %arg8[%c0_16, %c0_17] : memref<1x256xf32, #tpu.memory_space<vmem>>, vector<1x256xf32>
    %21 = vector.broadcast %20 : vector<1x256xf32> to vector<128x256xf32>
    %22 = arith.addf %19, %21 : vector<128x256xf32>
    %23 = math.tanh %22 : vector<128x256xf32>
    %24 = arith.truncf %23 : vector<128x256xf32> to vector<128x256xbf16>
    %c0_18 = arith.constant 0 : index
    %c0_19 = arith.constant 0 : index
    %25 = vector.load %arg9[%c0_18, %c0_19] : memref<256x128xbf16, #tpu.memory_space<vmem>>, vector<256x128xbf16>
    %cst_20 = arith.constant dense<0.000000e+00> : vector<128x128xf32>
    %26 = tpu.matmul %24, %25, %cst_20 {dimension_numbers = #tpu.dot_dimension_numbers<[1], [0], [0], [1], [0, 0, 1, 1], [], []>} : vector<128x256xbf16>, vector<256x128xbf16>, vector<128x128xf32> -> vector<128x128xf32>
    %c0_21 = arith.constant 0 : index
    %c0_22 = arith.constant 0 : index
    %27 = vector.load %arg10[%c0_21, %c0_22] : memref<1x128xf32, #tpu.memory_space<vmem>>, vector<1x128xf32>
    %28 = vector.broadcast %27 : vector<1x128xf32> to vector<128x128xf32>
    %29 = arith.addf %26, %28 : vector<128x128xf32>
    %30 = math.tanh %29 : vector<128x128xf32>
    %31 = arith.truncf %30 : vector<128x128xf32> to vector<128x128xbf16>
    %c0_23 = arith.constant 0 : index
    %c0_24 = arith.constant 0 : index
    %32 = vector.load %arg11[%c0_23, %c0_24] : memref<128x128xbf16, #tpu.memory_space<vmem>>, vector<128x128xbf16>
    %cst_25 = arith.constant dense<0.000000e+00> : vector<128x128xf32>
    %33 = tpu.matmul %31, %32, %cst_25 {dimension_numbers = #tpu.dot_dimension_numbers<[1], [0], [0], [1], [0, 0, 1, 1], [], []>} : vector<128x128xbf16>, vector<128x128xbf16>, vector<128x128xf32> -> vector<128x128xf32>
    %c0_26 = arith.constant 0 : index
    %c0_27 = arith.constant 0 : index
    %34 = vector.load %arg12[%c0_26, %c0_27] : memref<1x128xf32, #tpu.memory_space<vmem>>, vector<1x128xf32>
    %35 = vector.broadcast %34 : vector<1x128xf32> to vector<128x128xf32>
    %36 = arith.addf %33, %35 : vector<128x128xf32>
    %37 = math.tanh %36 : vector<128x128xf32>
    %c0_28 = arith.constant 0 : index
    %c0_29 = arith.constant 0 : index
    %38 = vector.load %arg13[%c0_28, %c0_29] : memref<1x128xf32, #tpu.memory_space<vmem>>, vector<1x128xf32>
    %39 = vector.broadcast %38 : vector<1x128xf32> to vector<128x128xf32>
    %40 = arith.mulf %37, %39 : vector<128x128xf32>
    %cst_30 = arith.constant dense<0.000000e+00> : vector<128xf32>
    %41 = vector.multi_reduction <add>, %40, %cst_30 [1] : vector<128x128xf32> to vector<128xf32>
    %42 = vector.shape_cast %41 : vector<128xf32> to vector<128x1xf32>
    %c0_31 = arith.constant 0 : index
    %c0_32 = arith.constant 0 : index
    %43 = vector.load %arg14[%c0_31, %c0_32] : memref<1x1xf32, #tpu.memory_space<vmem>>, vector<1x1xf32>
    %44 = vector.broadcast %43 : vector<1x1xf32> to vector<128x1xf32>
    %45 = arith.addf %42, %44 : vector<128x1xf32>
    %46 = tpu.iota {dimensions = array<i32: 0>} : vector<128x128xi32>
    %47 = tpu.iota {dimensions = array<i32: 1>} : vector<128x128xi32>
    %48 = arith.cmpi eq, %46, %47 : vector<128x128xi32>
    %49 = arith.extui %48 : vector<128x128xi1> to vector<128x128xi32>
    %50 = arith.sitofp %49 : vector<128x128xi32> to vector<128x128xf32>
    %51 = vector.broadcast %45 : vector<128x1xf32> to vector<128x128xf32>
    %52 = arith.mulf %51, %50 : vector<128x128xf32>
    %cst_33 = arith.constant dense<0.000000e+00> : vector<128xf32>
    %53 = vector.multi_reduction <add>, %52, %cst_33 [0] : vector<128x128xf32> to vector<128xf32>
    %54 = vector.shape_cast %53 : vector<128xf32> to vector<1x128xf32>
    %c0_34 = arith.constant 0 : index
    %c0_35 = arith.constant 0 : index
    %c0_36 = arith.constant 0 : index
    %55 = vector.load %arg15[%c0_34, %c0_35, %c0_36] : memref<1x1x128xf32, #tpu.memory_space<vmem>>, vector<1x1x128xf32>
    %56 = vector.shape_cast %55 : vector<1x1x128xf32> to vector<1x128xf32>
    %57 = vector.shape_cast %54 : vector<1x128xf32> to vector<1x1x128xf32>
    tpu.vector_store %arg15[%c0_34, %c0_35, %c0_36], %57 {strides = array<i32>} : memref<1x1x128xf32, #tpu.memory_space<vmem>>, vector<1x1x128xf32>,
    return
  }
  func.func @transform_0(%arg0: i32) -> (i32, i32) {
    %c0_i32 = arith.constant 0 : i32
    %c0_i32_0 = arith.constant 0 : i32
    return %arg0, %c0_i32 : i32, i32
  }
  func.func @transform_1(%arg0: i32) -> (i32, i32) {
    %c0_i32 = arith.constant 0 : i32
    %c0_i32_0 = arith.constant 0 : i32
    %c0_i32_1 = arith.constant 0 : i32
    return %c0_i32, %c0_i32_0 : i32, i32
  }
  func.func @transform_2(%arg0: i32) -> (i32, i32) {
    %c0_i32 = arith.constant 0 : i32
    %c0_i32_0 = arith.constant 0 : i32
    %c0_i32_1 = arith.constant 0 : i32
    return %c0_i32, %c0_i32_0 : i32, i32
  }
  func.func @transform_3(%arg0: i32) -> (i32, i32) {
    %c0_i32 = arith.constant 0 : i32
    %c0_i32_0 = arith.constant 0 : i32
    %c0_i32_1 = arith.constant 0 : i32
    return %c0_i32, %c0_i32_0 : i32, i32
  }
  func.func @transform_4(%arg0: i32) -> (i32, i32) {
    %c0_i32 = arith.constant 0 : i32
    %c0_i32_0 = arith.constant 0 : i32
    %c0_i32_1 = arith.constant 0 : i32
    return %c0_i32, %c0_i32_0 : i32, i32
  }
  func.func @transform_5(%arg0: i32) -> (i32, i32) {
    %c0_i32 = arith.constant 0 : i32
    %c0_i32_0 = arith.constant 0 : i32
    %c0_i32_1 = arith.constant 0 : i32
    return %c0_i32, %c0_i32_0 : i32, i32
  }
  func.func @transform_6(%arg0: i32) -> (i32, i32) {
    %c0_i32 = arith.constant 0 : i32
    %c0_i32_0 = arith.constant 0 : i32
    %c0_i32_1 = arith.constant 0 : i32
    return %c0_i32, %c0_i32_0 : i32, i32
  }
  func.func @transform_7(%arg0: i32) -> (i32, i32) {
    %c0_i32 = arith.constant 0 : i32
    %c0_i32_0 = arith.constant 0 : i32
    %c0_i32_1 = arith.constant 0 : i32
    return %c0_i32, %c0_i32_0 : i32, i32
  }
  func.func @transform_8(%arg0: i32) -> (i32, i32) {
    %c0_i32 = arith.constant 0 : i32
    %c0_i32_0 = arith.constant 0 : i32
    %c0_i32_1 = arith.constant 0 : i32
    return %c0_i32, %c0_i32_0 : i32, i32
  }
  func.func @transform_9(%arg0: i32) -> (i32, i32) {
    %c0_i32 = arith.constant 0 : i32
    %c0_i32_0 = arith.constant 0 : i32
    %c0_i32_1 = arith.constant 0 : i32
    return %c0_i32, %c0_i32_0 : i32, i32
  }
  func.func @transform_10(%arg0: i32) -> (i32, i32) {
    %c0_i32 = arith.constant 0 : i32
    %c0_i32_0 = arith.constant 0 : i32
    %c0_i32_1 = arith.constant 0 : i32
    return %c0_i32, %c0_i32_0 : i32, i32
  }
  func.func @transform_11(%arg0: i32) -> (i32, i32) {
    %c0_i32 = arith.constant 0 : i32
    %c0_i32_0 = arith.constant 0 : i32
    %c0_i32_1 = arith.constant 0 : i32
    return %c0_i32, %c0_i32_0 : i32, i32
  }
  func.func @transform_12(%arg0: i32) -> (i32, i32) {
    %c0_i32 = arith.constant 0 : i32
    %c0_i32_0 = arith.constant 0 : i32
    %c0_i32_1 = arith.constant 0 : i32
    return %c0_i32, %c0_i32_0 : i32, i32
  }
  func.func @transform_13(%arg0: i32) -> (i32, i32) {
    %c0_i32 = arith.constant 0 : i32
    %c0_i32_0 = arith.constant 0 : i32
    %c0_i32_1 = arith.constant 0 : i32
    return %c0_i32, %c0_i32_0 : i32, i32
  }
  func.func @transform_14(%arg0: i32) -> (i32, i32, i32) {
    %c0_i32 = arith.constant 0 : i32
    %c0_i32_0 = arith.constant 0 : i32
    %c0_i32_1 = arith.constant 0 : i32
    return %arg0, %c0_i32, %c0_i32_0 : i32, i32, i32
  }
}

</mosaic_0001>

<bundles_post_ra>
// kernel: tpu_custom_call.1
= control target key start
LH: loop header
LB: loop body
LE: loop exit
PB: predicated region body
PF: predicated region fallthrough
CT: control target
= control target key end

     0   :  { %s3431_s0 = inlined_call_operand.hbm [shape: bf16[128,256], index: 0, kind: input, shape index: {}]   ;;  %s3432_s1 = inlined_call_operand.hbm [shape: bf16[256,128], index: 1, kind: input, shape index: {}]   ;;  %s3433_s2 = inlined_call_operand.vmem [shape: f32[1,128], index: 2, kind: input, shape index: {}]   ;;  %s3434_s3 = inlined_call_operand.hbm [shape: bf16[128,128], index: 3, kind: input, shape index: {}]   ;;  %s3435_s4 = inlined_call_operand.vmem [shape: f32[1,128], index: 4, kind: input, shape index: {}]   ;;  %s3436_s5 = inlined_call_operand.hbm [shape: bf16[256,256], index: 5, kind: input, shape index: {}]   ;;  %s3437_s6 = inlined_call_operand.hbm [shape: bf16[128,256], index: 6, kind: input, shape index: {}]   ;;  %s3438_s7 = inlined_call_operand.vmem [shape: f32[1,256], index: 7, kind: input, shape index: {}]   ;;  %s3439_s8 = inlined_call_operand.hbm [shape: bf16[256,128], index: 8, kind: input, shape index: {}]   ;;  %s3440_s9 = inlined_call_operand.vmem [shape: f32[1,128], index: 9, kind: input, shape index: {}]   ;;  %s3441_s10 = inlined_call_operand.hbm [shape: bf16[128,128], index: 10, kind: input, shape index: {}]   ;;  %s3442_s11 = inlined_call_operand.vmem [shape: f32[1,128], index: 11, kind: input, shape index: {}]   ;;  %s3443_s12 = inlined_call_operand.vmem [shape: f32[1,128], index: 12, kind: input, shape index: {}]   ;;  %s3444_s13 = inlined_call_operand.<no memory space> [shape: f32[1,1], index: 13, kind: input, shape index: {}]   ;;  %s3445_s14 = inlined_call_operand.hbm [shape: f32[1,1,128], index: 14, kind: output, shape index: {}]  }
   0x1   :  { %v19_v0 = vstv %s3444_s13 }
   0x2   :  { %20 = vst [vmem:[#allocation2] sm:$0x1] %v19_v0 }
   0x3   :  { %21 = vsyncpa [#allocation4], 0 }
   0x4   :  { %22 = vsyncpa [#allocation7], 0 }
   0x5   :  { %23 = vsyncpa [#allocation10], 0 }
   0x6   :  { %24 = vsyncpa [#allocation13], 0  ;;  %s43_s17 = sshll.u32 %s3432_s1, 4  ;;  %s44_s17 = int_to_ptr.hbm [resolvable:$true] %s43_s17 }
   0x7   :  { %25 = vsyncpa [#allocation5], 0  ;;  %s2975_s18 = smov [#allocation6]   ;;  %s2976_s20 = smov 64  }
   0x8   :  { %s45_s19 = sshll.u32 %s2975_s18, 4  ;;  %s2977_s21 = smov 4   ;;  %s46_s19 = int_to_ptr.vmem [resolvable:$true] %s45_s19 }
   0x9   :  { %51 = dma.hbm_to_vmem [thread:$0]  %s44_s17, 2048, %s46_s19, [#allocation7], %s2976_s20, %s2976_s20, %s2977_s21  }
   0xa   :  { %s73_s23 = sshll.u32 %s3436_s5, 4  ;;  %s2978_s24 = smov [#allocation9]   ;;  %s74_s23 = int_to_ptr.hbm [resolvable:$true] %s73_s23 }
   0xb   :  { %s75_s25 = sshll.u32 %s2978_s24, 4  ;;  %s101_s27 = sshll.u32 %s3439_s8, 4  ;;  %s76_s25 = int_to_ptr.vmem [resolvable:$true] %s75_s25  ;;  %s102_s27 = int_to_ptr.hbm [resolvable:$true] %s101_s27 }
   0xc   :  { %s2979_s28 = smov 128   ;;  %s2980_s29 = smov 8  }
   0xd   :  { %81 = dma.hbm_to_vmem [thread:$0]  %s74_s23, 4096, %s76_s25, [#allocation10], %s2979_s28, %s2979_s28, %s2980_s29  }
   0xe   :  { %s30_s16 = sshll.u32 %s3431_s0, 4  ;;  %s2981_s17 = smov [#allocation12]   ;;  %s31_s16 = int_to_ptr.hbm [resolvable:$true] %s30_s16 }
   0xf   :  { %s103_s18 = sshll.u32 %s2981_s17, 4  ;;  %s2982_s5 = smov [#allocation3]   ;;  %s104_s18 = int_to_ptr.vmem [resolvable:$true] %s103_s18 }
  0x10   :  { %109 = dma.hbm_to_vmem [thread:$0]  %s102_s27, 2048, %s104_s18, [#allocation13], %s2976_s20, %s2976_s20, %s2977_s21  }
  0x11   :  { %s32_s19 = sshll.u32 %s2982_s5, 4  ;;  %s58_s22 = sshll.u32 %s3434_s3, 4  ;;  %s33_s19 = int_to_ptr.vmem [resolvable:$true] %s32_s19  ;;  %s59_s22 = int_to_ptr.hbm [resolvable:$true] %s58_s22 }
  0x12   :  { %38 = dma.hbm_to_vmem [thread:$0]  %s31_s16, 2048, %s33_s19, [#allocation4], %s2979_s28, %s2979_s28, %s2980_s29  }
  0x13   :  { %s86_s0 = sshll.u32 %s3437_s6, 4  ;;  %s2983_s25 = smov [#allocation8]   ;;  %s87_s0 = int_to_ptr.hbm [resolvable:$true] %s86_s0 }
  0x14   :  { %s60_s26 = sshll.u32 %s2983_s25, 4  ;;  %s2984_s1 = smov [#allocation11]   ;;  %s61_s26 = int_to_ptr.vmem [resolvable:$true] %s60_s26 }
  0x15   :  { %66 = dma.hbm_to_vmem [thread:$0]  %s59_s22, 1024, %s61_s26, [#allocation7], %s2976_s20, %s2976_s20, %s2977_s21  }
  0x16   :  { %s88_s27 = sshll.u32 %s2984_s1, 4  ;;  %s116_s3 = sshll.u32 %s3441_s10, 4  ;;  %s89_s27 = int_to_ptr.vmem [resolvable:$true] %s88_s27  ;;  %s117_s3 = int_to_ptr.hbm [resolvable:$true] %s116_s3 }
  0x17   :  { %94 = dma.hbm_to_vmem [thread:$0]  %s87_s0, 2048, %s89_s27, [#allocation10], %s2979_s28, %s2979_s28, %s2980_s29  }
  0x18   :  { %s2985_s16 = smov [#allocation14]  }
  0x19   :  { %s118_s17 = sshll.u32 %s2985_s16, 4  ;;  %s119_s17 = int_to_ptr.vmem [resolvable:$true] %s118_s17 }
  0x1a   :  { %124 = dma.hbm_to_vmem [thread:$0]  %s117_s3, 1024, %s119_s17, [#allocation13], %s2976_s20, %s2976_s20, %s2977_s21  }
  0x1b   :  { %2965 = dma.done.wait [#allocation4], 2048  }
  0x1c   :  { %2966 = vsyncadd [#allocation4], 4294965248 }
  0x1d   :  { %2967 = dma.done.wait [#allocation7], 3072  }
  0x1e   :  { %2968 = vsyncadd [#allocation7], 4294964224 }
  0x1f   :  { %2969 = dma.done.wait [#allocation10], 6144  }
  0x20   :  { %2970 = vsyncadd [#allocation10], 4294961152 }
  0x21   :  { %2971 = dma.done.wait [#allocation13], 3072  }
  0x22   :  { %2972 = vsyncadd [#allocation13], 4294964224  ;;  %v2469_v1 = vld [vmem:[#allocation6 + $0x38] sm:$0xff]  ;;  %v2468_v3 = vld [vmem:[#allocation6 + $0x30] sm:$0xff]  ;;  %s1969_s13 = sshll.u32 %s3445_s14, 4  ;;  %s1970_s13 = int_to_ptr.hbm [resolvable:$true] %s1969_s13 }
  0x23   :  { %v2477_v2 = vld [vmem:[#allocation6 + $0x78] sm:$0xff]  ;;  %387 = vmatpush.bf16.msra.mxu0 %v2469_v1  ;;  %v2476_v4 = vld [vmem:[#allocation6 + $0x70] sm:$0xff]  ;;  %v2467_v5 = vld [vmem:[#allocation6 + $0x28] sm:$0xff] }
  0x24   :  { %436 = vmatpush.bf16.msra.mxu1 %v2477_v2  ;;  %v2475_v6 = vld [vmem:[#allocation6 + $0x68] sm:$0xff]  ;;  %v2466_v7 = vld [vmem:[#allocation6 + $0x20] sm:$0xff]  ;;  %v2465_v9 = vld [vmem:[#allocation6 + $0x18] sm:$0xff] }
  0x25   :  { %v2474_v8 = vld [vmem:[#allocation6 + $0x60] sm:$0xff]  ;;  %v2473_v10 = vld [vmem:[#allocation6 + $0x58] sm:$0xff]  ;;  %v2464_v11 = vld [vmem:[#allocation6 + $0x10] sm:$0xff] }
  0x26   :  { %v2472_v12 = vld [vmem:[#allocation6 + $0x50] sm:$0xff]  ;;  %v2463_v13 = vld [vmem:[#allocation6 + $0x8] sm:$0xff]  ;;  %v2462_v15 = vld [vmem:[#allocation6] sm:$0xff] }
  0x27   :  { %388 = vmatpush.bf16.msra.mxu0 %v2468_v3  ;;  %v2471_v14 = vld [vmem:[#allocation6 + $0x48] sm:$0xff]  ;;  %v2470_v16 = vld [vmem:[#allocation6 + $0x40] sm:$0xff]  ;;  %v1992_v23 = vld [vmem:[#allocation3 + $0x10] sm:$0xf] }
  0x28   :  { %437 = vmatpush.bf16.msra.mxu1 %v2476_v4  ;;  %v1984_v17 = vld [vmem:[#allocation3] sm:$0xf]  ;;  %v2447_v18 = vld [vmem:[#allocation3 + $0x4] sm:$0xf0]  ;;  %v2446_v19 = vld [vmem:[#allocation3 + $0x4] sm:$0xf] }
  0x29   :  { %v1986_v20 = vld [vmem:[#allocation3 + $0x8] sm:$0xf0]  ;;  %v3100_v21 = vor.u32 %v2447_v18, %v1984_v17  ;;  %v2449_v24 = vld [vmem:[#allocation3 + $0x14] sm:$0xf0]  ;;  %v2448_v25 = vld [vmem:[#allocation3 + $0x14] sm:$0xf] }
  0x2a   :  { %v3102_v22 = vor.u32 %v2446_v19, %v1986_v20  ;;  %v1994_v26 = vld [vmem:[#allocation3 + $0x18] sm:$0xf0]  ;;  %v3106_v27 = vor.u32 %v2449_v24, %v1992_v23  ;;  %v2000_v29 = vld [vmem:[#allocation3 + $0x20] sm:$0xf]  ;;  %v2451_v30 = vld [vmem:[#allocation3 + $0x24] sm:$0xf0] }
  0x2b   :  { %389 = vmatpush.bf16.msra.mxu0 %v2467_v5  ;;  %v3108_v28 = vor.u32 %v2448_v25, %v1994_v26  ;;  %v2450_v31 = vld [vmem:[#allocation3 + $0x24] sm:$0xf]  ;;  %v2002_v32 = vld [vmem:[#allocation3 + $0x28] sm:$0xf0]  ;;  %v3112_v33 = vor.u32 %v2451_v30, %v2000_v29  ;;  %v2008_v35 = vld [vmem:[#allocation3 + $0x30] sm:$0xf] }
  0x2c   :  { %438 = vmatpush.bf16.msra.mxu1 %v2475_v6  ;;  %v3114_v34 = vor.u32 %v2450_v31, %v2002_v32  ;;  %v2453_v36 = vld [vmem:[#allocation3 + $0x34] sm:$0xf0]  ;;  %v2452_v37 = vld [vmem:[#allocation3 + $0x34] sm:$0xf]  ;;  %v2010_v38 = vld [vmem:[#allocation3 + $0x38] sm:$0xf0] }
  0x2d   :  { %v3118_v39 = vor.u32 %v2453_v36, %v2008_v35  ;;  %v3120_v40 = vor.u32 %v2452_v37, %v2010_v38  ;;  %v2016_v41 = vld [vmem:[#allocation3 + $0x40] sm:$0xf]  ;;  %v2455_v42 = vld [vmem:[#allocation3 + $0x44] sm:$0xf0]  ;;  %v2454_v43 = vld [vmem:[#allocation3 + $0x44] sm:$0xf] }
  0x2e   :  { %v2018_v44 = vld [vmem:[#allocation3 + $0x48] sm:$0xf0]  ;;  %v3124_v45 = vor.u32 %v2455_v42, %v2016_v41  ;;  %v2024_v47 = vld [vmem:[#allocation3 + $0x50] sm:$0xf]  ;;  %v2457_v48 = vld [vmem:[#allocation3 + $0x54] sm:$0xf0] }
  0x2f   :  { %390 = vmatpush.bf16.msra.mxu0 %v2466_v7  ;;  %v3126_v46 = vor.u32 %v2454_v43, %v2018_v44  ;;  %v2456_v49 = vld [vmem:[#allocation3 + $0x54] sm:$0xf]  ;;  %v2026_v50 = vld [vmem:[#allocation3 + $0x58] sm:$0xf0]  ;;  %v3130_v51 = vor.u32 %v2457_v48, %v2024_v47  ;;  %v2483_v55 = vld [vmem:[#allocation8 + $0x28] sm:$0xff] }
  0x30   :  { %439 = vmatpush.bf16.msra.mxu1 %v2474_v8  ;;  %v3132_v52 = vor.u32 %v2456_v49, %v2026_v50  ;;  %v2485_v53 = vld [vmem:[#allocation8 + $0x38] sm:$0xff]  ;;  %v2484_v54 = vld [vmem:[#allocation8 + $0x30] sm:$0xff]  ;;  %v2032_v56 = vld [vmem:[#allocation3 + $0x60] sm:$0xf] }
  0x31   :  { %577 = vmatpush.bf16.msra.mxu2 %v2485_v53  ;;  %v2459_v57 = vld [vmem:[#allocation3 + $0x64] sm:$0xf0]  ;;  %v2458_v58 = vld [vmem:[#allocation3 + $0x64] sm:$0xf]  ;;  %v2034_v59 = vld [vmem:[#allocation3 + $0x68] sm:$0xf0] }
  0x32   :  { %v3136_v60 = vor.u32 %v2459_v57, %v2032_v56  ;;  %v3138_v61 = vor.u32 %v2458_v58, %v2034_v59  ;;  %v2482_v62 = vld [vmem:[#allocation8 + $0x20] sm:$0xff]  ;;  %v2481_v63 = vld [vmem:[#allocation8 + $0x18] sm:$0xff]  ;;  %v2480_v0 = vld [vmem:[#allocation8 + $0x10] sm:$0xff] }
  0x33   :  { %391 = vmatpush.bf16.msra.mxu0 %v2465_v9  ;;  %v2040_v1 = vld [vmem:[#allocation3 + $0x70] sm:$0xf]  ;;  %v2461_v2 = vld [vmem:[#allocation3 + $0x74] sm:$0xf0]  ;;  %v2460_v3 = vld [vmem:[#allocation3 + $0x74] sm:$0xf] }
  0x34   :  { %440 = vmatpush.bf16.msra.mxu1 %v2473_v10  ;;  %v2042_v4 = vld [vmem:[#allocation3 + $0x78] sm:$0xf0]  ;;  %v2479_v5 = vld [vmem:[#allocation8 + $0x8] sm:$0xff]  ;;  %v3142_v6 = vor.u32 %v2461_v2, %v2040_v1  ;;  %v2478_v8 = vld [vmem:[#allocation8] sm:$0xff] }
  0x35   :  { %578 = vmatpush.bf16.msra.mxu2 %v2484_v54  ;;  %v3144_v7 = vor.u32 %v2460_v3, %v2042_v4  ;;  %v3151_v9 = vld [vmem:[%s3433_s2] ss:$0 sm:$0xff]  ;;  %v2532_v26 = vld [vmem:[#allocation11 + $0x74] sm:$0xf]  ;;  %v2530_v48 = vld [vmem:[#allocation11 + $0x64] sm:$0xf] }
  0x36   :  { %v2202_v29 = vld [vmem:[#allocation11 + $0x78] sm:$0xf0]  ;;  %v2194_v49 = vld [vmem:[#allocation11 + $0x68] sm:$0xf0]  ;;  %v2528_v2 = vld [vmem:[#allocation11 + $0x54] sm:$0xf] }
  0x37   :  { %392 = vmatpush.bf16.msra.mxu0 %v2464_v11  ;;  %v2205_v30 = vor.u32 %v2532_v26, %v2202_v29  ;;  %v2197_v50 = vor.u32 %v2530_v48, %v2194_v49  ;;  %v2186_v3 = vld [vmem:[#allocation11 + $0x58] sm:$0xf0] }
  0x38   :  { %441 = vmatpush.bf16.msra.mxu1 %v2472_v12  ;;  %v2189_v4 = vor.u32 %v2528_v2, %v2186_v3  ;;  %v2328_v2 = vld [vmem:[#allocation9 + $0xf0] sm:$0xf] }
  0x39   :  { %579 = vmatpush.bf16.msra.mxu2 %v2483_v55 }
  0x3b   :  { %393 = vmatpush.bf16.msra.mxu0 %v2463_v13 }
  0x3c   :  { %442 = vmatpush.bf16.msra.mxu1 %v2471_v14 }
  0x3d   :  { %580 = vmatpush.bf16.msra.mxu2 %v2482_v62 }
  0x3f   :  { %394 = vmatpush.bf16.msra.mxu0 %v2462_v15 }
  0x40   :  { %443 = vmatpush.bf16.msra.mxu1 %v2470_v16 }
  0x41   :  { %581 = vmatpush.bf16.msra.mxu2 %v2481_v63 }
  0x42   :  { %395 = vmatmul.bf16.vlgmr.msra.gmra.mxu0 %v3100_v21 }
  0x43   :  { %444 = vmatmul.bf16.vlgmr.msra.gmra.mxu1 %v3102_v22  ;;  %827 = vmatpush.bf16.msrb.mxu0 %v2205_v30 }
  0x45   :  { %582 = vmatpush.bf16.msra.mxu2 %v2480_v0 }
  0x47   :  { %828 = vmatpush.bf16.msrb.mxu0 %v2197_v50 }
  0x49   :  { %583 = vmatpush.bf16.msra.mxu2 %v2479_v5 }
  0x4b   :  { %829 = vmatpush.bf16.msrb.mxu0 %v2189_v4  ;;  %v2517_v4 = vld [vmem:[#allocation9 + $0xf4] sm:$0xf0] }
  0x4d   :  { %584 = vmatpush.bf16.msra.mxu2 %v2478_v8 }
  0x52   :  { %400 = vmatmul.bf16.gmra.mxu0 %v3106_v27 }
  0x53   :  { %449 = vmatmul.bf16.gmra.mxu1 %v3108_v28 }
  0x62   :  { %405 = vmatmul.bf16.gmra.mxu0 %v3112_v33 }
  0x63   :  { %454 = vmatmul.bf16.gmra.mxu1 %v3114_v34 }
  0x72   :  { %410 = vmatmul.bf16.gmra.mxu0 %v3118_v39 }
  0x73   :  { %459 = vmatmul.bf16.gmra.mxu1 %v3120_v40 }
  0x82   :  { %415 = vmatmul.bf16.gmra.mxu0 %v3124_v45 }
  0x83   :  { %464 = vmatmul.bf16.gmra.mxu1 %v3126_v46 }
  0x92   :  { %420 = vmatmul.bf16.gmra.mxu0 %v3130_v51 }
  0x93   :  { %469 = vmatmul.bf16.gmra.mxu1 %v3132_v52 }
  0xa2   :  { %425 = vmatmul.bf16.gmra.mxu0 %v3136_v60 }
  0xa3   :  { %474 = vmatmul.bf16.gmra.mxu1 %v3138_v61 }
  0xb2   :  { %430 = vmatmul.bf16.gmra.mxu0 %v3142_v6 }
  0xb3   :  { %479 = vmatmul.bf16.gmra.mxu1 %v3144_v7 }
  0xbf   :  { %v396_v10 = vpop.f32.mrf.mxu0 }
  0xc0   :  { %v445_v11 = vpop.f32.mrf.mxu1  ;;  %v397_v12 = vadd.f32 %v3151_v9, %v396_v10 }
  0xc2   :  { %v446_v13 = vadd.f32 %v445_v11, %v397_v12 }
  0xc4   :  { %2581 = vtanh.f32 %v446_v13 }
  0xc7   :  { %v398_v14 = vpop.f32.mrf.mxu0 }
  0xc8   :  { %v447_v15 = vpop.f32.mrf.mxu1  ;;  %v399_v16 = vadd.f32 %v3151_v9, %v398_v14 }
  0xca   :  { %v448_v17 = vadd.f32 %v447_v15, %v399_v16  ;;  %v2582_v20 = vpop.eup %2581 }
  0xcc   :  { %2583 = vtanh.f32 %v448_v17 }
  0xcf   :  { %v401_v18 = vpop.f32.mrf.mxu0 }
  0xd0   :  { %v450_v19 = vpop.f32.mrf.mxu1  ;;  %v402_v24 = vadd.f32 %v3151_v9, %v401_v18 }
  0xd2   :  { %v2584_v23 = vpop.eup %2583  ;;  %v451_v31 = vadd.f32 %v450_v19, %v402_v24  ;;  %v2526_v19 = vld [vmem:[#allocation11 + $0x44] sm:$0xf] }
  0xd3   :  { %v501_v25 = vpack.c.bf16 %v2584_v23, %v2582_v20  ;;  %v2178_v20 = vld [vmem:[#allocation11 + $0x48] sm:$0xf0] }
  0xd4   :  { %2585 = vtanh.f32 %v451_v31  ;;  %v2181_v23 = vor.u32 %v2526_v19, %v2178_v20  ;;  %v2515_v20 = vld [vmem:[#allocation9 + $0xe4] sm:$0xf0] }
  0xd5   :  { %585 = vmatmul.bf16.vlgmr.msra.gmra.mxu2 %v501_v25 }
  0xd6   :  { %830 = vmatpush.bf16.msrb.mxu0 %v2181_v23  ;;  %v2520_v23 = vld [vmem:[#allocation11 + $0x14] sm:$0xf] }
  0xd7   :  { %v403_v32 = vpop.f32.mrf.mxu0 }
  0xd8   :  { %v452_v35 = vpop.f32.mrf.mxu1  ;;  %v404_v36 = vadd.f32 %v3151_v9, %v403_v32 }
  0xda   :  { %v453_v37 = vadd.f32 %v452_v35, %v404_v36  ;;  %v2586_v42 = vpop.eup %2585 }
  0xdc   :  { %2587 = vtanh.f32 %v453_v37 }
  0xdf   :  { %v406_v38 = vpop.f32.mrf.mxu0 }
  0xe0   :  { %v455_v41 = vpop.f32.mrf.mxu1  ;;  %v407_v44 = vadd.f32 %v3151_v9, %v406_v38 }
  0xe2   :  { %v2588_v43 = vpop.eup %2587  ;;  %v456_v53 = vadd.f32 %v455_v41, %v407_v44  ;;  %v2524_v41 = vld [vmem:[#allocation11 + $0x34] sm:$0xf] }
  0xe3   :  { %v502_v47 = vpack.c.bf16 %v2588_v43, %v2586_v42  ;;  %v2170_v42 = vld [vmem:[#allocation11 + $0x38] sm:$0xf0] }
  0xe4   :  { %2589 = vtanh.f32 %v456_v53  ;;  %v2173_v43 = vor.u32 %v2524_v41, %v2170_v42  ;;  %v2522_v53 = vld [vmem:[#allocation11 + $0x24] sm:$0xf] }
  0xe5   :  { %590 = vmatmul.bf16.gmra.mxu2 %v502_v47 }
  0xe6   :  { %831 = vmatpush.bf16.msrb.mxu0 %v2173_v43 }
  0xe7   :  { %v408_v54 = vpop.f32.mrf.mxu0 }
  0xe8   :  { %v457_v55 = vpop.f32.mrf.mxu1  ;;  %v409_v56 = vadd.f32 %v3151_v9, %v408_v54  ;;  %v2162_v54 = vld [vmem:[#allocation11 + $0x28] sm:$0xf0] }
  0xea   :  { %v458_v57 = vadd.f32 %v457_v55, %v409_v56  ;;  %v2590_v62 = vpop.eup %2589  ;;  %v2165_v55 = vor.u32 %v2522_v53, %v2162_v54  ;;  %v2176_v53 = vld [vmem:[#allocation11 + $0x40] sm:$0xf]  ;;  %v2527_v54 = vld [vmem:[#allocation11 + $0x44] sm:$0xf0] }
  0xec   :  { %2591 = vtanh.f32 %v458_v57  ;;  %832 = vmatpush.bf16.msrb.mxu0 %v2165_v55 }
  0xef   :  { %v411_v58 = vpop.f32.mrf.mxu0 }
  0xf0   :  { %v460_v59 = vpop.f32.mrf.mxu1  ;;  %v412_v0 = vadd.f32 %v3151_v9, %v411_v58 }
  0xf2   :  { %v2592_v63 = vpop.eup %2591  ;;  %v461_v5 = vadd.f32 %v460_v59, %v412_v0  ;;  %v2200_v0 = vld [vmem:[#allocation11 + $0x70] sm:$0xf] }
  0xf3   :  { %v503_v1 = vpack.c.bf16 %v2592_v63, %v2590_v62 }
  0xf4   :  { %2593 = vtanh.f32 %v461_v5  ;;  %v2192_v5 = vld [vmem:[#allocation11 + $0x60] sm:$0xf] }
  0xf5   :  { %595 = vmatmul.bf16.gmra.mxu2 %v503_v1  ;;  %v2533_v1 = vld [vmem:[#allocation11 + $0x74] sm:$0xf0] }
  0xf6   :  { %v2201_v3 = vor.u32 %v2533_v1, %v2200_v0 }
  0xf7   :  { %v413_v8 = vpop.f32.mrf.mxu0 }
  0xf8   :  { %v462_v10 = vpop.f32.mrf.mxu1  ;;  %v414_v11 = vadd.f32 %v3151_v9, %v413_v8  ;;  %v2531_v8 = vld [vmem:[#allocation11 + $0x64] sm:$0xf0]  ;;  %778 = vmatpush.bf16.msra.mxu3 %v2201_v3 }
  0xfa   :  { %v463_v12 = vadd.f32 %v462_v10, %v414_v11  ;;  %v2594_v15 = vpop.eup %2593 }
  0xfc   :  { %2595 = vtanh.f32 %v463_v12 }
  0xff   :  { %v416_v13 = vpop.f32.mrf.mxu0 }
 0x100   :  { %v465_v14 = vpop.f32.mrf.mxu1  ;;  %v417_v17 = vadd.f32 %v3151_v9, %v416_v13  ;;  %v2329_v13 = vor.u32 %v2517_v4, %v2328_v2  ;;  %v2511_v2 = vld [vmem:[#allocation9 + $0xc4] sm:$0xf0] }
 0x102   :  { %v2596_v16 = vpop.eup %2595  ;;  %v466_v24 = vadd.f32 %v465_v14, %v417_v17  ;;  %v2264_v14 = vld [vmem:[#allocation9 + $0x70] sm:$0xf]  ;;  %1085 = vmatpush.bf16.msrb.mxu2 %v2329_v13 }
 0x103   :  { %v504_v18 = vpack.c.bf16 %v2596_v16, %v2594_v15  ;;  %v2501_v15 = vld [vmem:[#allocation9 + $0x74] sm:$0xf0]  ;;  %v2320_v16 = vld [vmem:[#allocation9 + $0xe0] sm:$0xf]  ;;  %v2296_v13 = vld [vmem:[#allocation9 + $0xb0] sm:$0xf] }
 0x104   :  { %2597 = vtanh.f32 %v466_v24  ;;  %v2265_v19 = vor.u32 %v2501_v15, %v2264_v14  ;;  %v2154_v24 = vld [vmem:[#allocation11 + $0x18] sm:$0xf0]  ;;  %v2509_v14 = vld [vmem:[#allocation9 + $0xb4] sm:$0xf0] }
 0x105   :  { %600 = vmatmul.bf16.gmra.mxu2 %v504_v18  ;;  %v2193_v18 = vor.u32 %v2531_v8, %v2192_v5  ;;  %v2168_v5 = vld [vmem:[#allocation11 + $0x30] sm:$0xf]  ;;  %v2525_v8 = vld [vmem:[#allocation11 + $0x34] sm:$0xf0]  ;;  %v2297_v15 = vor.u32 %v2509_v14, %v2296_v13  ;;  %v2498_v13 = vld [vmem:[#allocation9 + $0x64] sm:$0xf] }
 0x106   :  { %1036 = vmatpush.bf16.msrb.mxu1 %v2265_v19  ;;  %v2232_v19 = vld [vmem:[#allocation9 + $0x30] sm:$0xf] }
 0x107   :  { %v418_v25 = vpop.f32.mrf.mxu0  ;;  %779 = vmatpush.bf16.msra.mxu3 %v2193_v18 }
 0x108   :  { %v467_v26 = vpop.f32.mrf.mxu1  ;;  %v419_v29 = vadd.f32 %v3151_v9, %v418_v25  ;;  %v2321_v25 = vor.u32 %v2515_v20, %v2320_v16  ;;  %v2160_v16 = vld [vmem:[#allocation11 + $0x20] sm:$0xf]  ;;  %v2493_v20 = vld [vmem:[#allocation9 + $0x34] sm:$0xf0] }
 0x10a   :  { %v468_v30 = vadd.f32 %v467_v26, %v419_v29  ;;  %v2598_v35 = vpop.eup %2597  ;;  %v2157_v26 = vor.u32 %v2520_v23, %v2154_v24  ;;  %v2184_v29 = vld [vmem:[#allocation11 + $0x50] sm:$0xf]  ;;  %1086 = vmatpush.bf16.msrb.mxu2 %v2321_v25  ;;  %v2288_v23 = vld [vmem:[#allocation9 + $0xa0] sm:$0xf]  ;;  %v2233_v25 = vor.u32 %v2493_v20, %v2232_v19  ;;  %v2322_v19 = vld [vmem:[#allocation9 + $0xe8] sm:$0xf0] }
 0x10c   :  { %2599 = vtanh.f32 %v468_v30  ;;  %v2529_v30 = vld [vmem:[#allocation11 + $0x54] sm:$0xf0]  ;;  %833 = vmatpush.bf16.msrb.mxu0 %v2157_v26  ;;  %v2507_v26 = vld [vmem:[#allocation9 + $0xa4] sm:$0xf0] }
 0x10d   :  { %v2185_v41 = vor.u32 %v2529_v30, %v2184_v29  ;;  %v2289_v30 = vor.u32 %v2507_v26, %v2288_v23 }
 0x10f   :  { %v421_v31 = vpop.f32.mrf.mxu0  ;;  %780 = vmatpush.bf16.msra.mxu3 %v2185_v41  ;;  %v2224_v41 = vld [vmem:[#allocation9 + $0x20] sm:$0xf] }
 0x110   :  { %v470_v32 = vpop.f32.mrf.mxu1  ;;  %v422_v37 = vadd.f32 %v3151_v9, %v421_v31  ;;  %v2256_v31 = vld [vmem:[#allocation9 + $0x60] sm:$0xf] }
 0x112   :  { %v2600_v36 = vpop.eup %2599  ;;  %v471_v44 = vadd.f32 %v470_v32, %v422_v37  ;;  %v2513_v37 = vld [vmem:[#allocation9 + $0xd4] sm:$0xf0] }
 0x113   :  { %v505_v38 = vpack.c.bf16 %v2600_v36, %v2598_v35  ;;  %v2499_v35 = vld [vmem:[#allocation9 + $0x64] sm:$0xf0]  ;;  %v2312_v36 = vld [vmem:[#allocation9 + $0xd0] sm:$0xf] }
 0x114   :  { %2601 = vtanh.f32 %v471_v44  ;;  %v2313_v42 = vor.u32 %v2513_v37, %v2312_v36  ;;  %v2518_v36 = vld [vmem:[#allocation11 + $0x4] sm:$0xf]  ;;  %v2146_v37 = vld [vmem:[#allocation11 + $0x8] sm:$0xf0] }
 0x115   :  { %605 = vmatmul.bf16.gmra.mxu2 %v505_v38  ;;  %v2257_v38 = vor.u32 %v2499_v35, %v2256_v31  ;;  %v2152_v31 = vld [vmem:[#allocation11 + $0x10] sm:$0xf] }
 0x116   :  { %1087 = vmatpush.bf16.msrb.mxu2 %v2313_v42  ;;  %v2149_v42 = vor.u32 %v2518_v36, %v2146_v37  ;;  %v2512_v37 = vld [vmem:[#allocation9 + $0xd4] sm:$0xf] }
 0x117   :  { %v423_v47 = vpop.f32.mrf.mxu0  ;;  %1037 = vmatpush.bf16.msrb.mxu1 %v2257_v38 }
 0x118   :  { %v472_v48 = vpop.f32.mrf.mxu1  ;;  %v424_v49 = vadd.f32 %v3151_v9, %v423_v47  ;;  %834 = vmatpush.bf16.msrb.mxu0 %v2149_v42 }
 0x11a   :  { %v473_v50 = vadd.f32 %v472_v48, %v424_v49  ;;  %v2602_v58 = vpop.eup %2601 }
 0x11c   :  { %2603 = vtanh.f32 %v473_v50 }
 0x11f   :  { %v426_v56 = vpop.f32.mrf.mxu0 }
 0x120   :  { %v475_v57 = vpop.f32.mrf.mxu1  ;;  %v427_v62 = vadd.f32 %v3151_v9, %v426_v56 }
 0x122   :  { %v2604_v59 = vpop.eup %2603  ;;  %v476_v10 = vadd.f32 %v475_v57, %v427_v62  ;;  %v2177_v57 = vor.u32 %v2527_v54, %v2176_v53  ;;  %v2497_v62 = vld [vmem:[#allocation9 + $0x54] sm:$0xf0]  ;;  %v2519_v53 = vld [vmem:[#allocation11 + $0x4] sm:$0xf0] }
 0x123   :  { %v506_v63 = vpack.c.bf16 %v2604_v59, %v2602_v58  ;;  %v2248_v59 = vld [vmem:[#allocation9 + $0x50] sm:$0xf] }
 0x124   :  { %2605 = vtanh.f32 %v476_v10  ;;  %781 = vmatpush.bf16.msra.mxu3 %v2177_v57  ;;  %v2249_v1 = vor.u32 %v2497_v62, %v2248_v59  ;;  %v2169_v10 = vor.u32 %v2525_v8, %v2168_v5  ;;  %v2272_v57 = vld [vmem:[#allocation9 + $0x80] sm:$0xf]  ;;  %v2503_v59 = vld [vmem:[#allocation9 + $0x84] sm:$0xf0]  ;;  %v2516_v5 = vld [vmem:[#allocation9 + $0xf4] sm:$0xf] }
 0x125   :  { %610 = vmatmul.bf16.gmra.mxu2 %v506_v63  ;;  %v2304_v63 = vld [vmem:[#allocation9 + $0xc0] sm:$0xf]  ;;  %v2273_v62 = vor.u32 %v2503_v59, %v2272_v57  ;;  %v2330_v8 = vld [vmem:[#allocation9 + $0xf8] sm:$0xf0]  ;;  %v2306_v57 = vld [vmem:[#allocation9 + $0xc8] sm:$0xf0] }
 0x126   :  { %v2305_v4 = vor.u32 %v2511_v2, %v2304_v63  ;;  %1038 = vmatpush.bf16.msrb.mxu1 %v2249_v1  ;;  %v2500_v63 = vld [vmem:[#allocation9 + $0x74] sm:$0xf]  ;;  %v2208_v1 = vld [vmem:[#allocation9] sm:$0xf] }
 0x127   :  { %v428_v11 = vpop.f32.mrf.mxu0 }
 0x128   :  { %v477_v12 = vpop.f32.mrf.mxu1  ;;  %v429_v17 = vadd.f32 %v3151_v9, %v428_v11  ;;  %v2240_v11 = vld [vmem:[#allocation9 + $0x40] sm:$0xf]  ;;  %1088 = vmatpush.bf16.msrb.mxu2 %v2305_v4  ;;  %782 = vmatpush.bf16.msra.mxu3 %v2169_v10  ;;  %v2333_v10 = vor.u32 %v2516_v5, %v2330_v8 }
 0x12a   :  { %v478_v32 = vadd.f32 %v477_v12, %v429_v17  ;;  %v2606_v47 = vpop.eup %2605  ;;  %v2495_v12 = vld [vmem:[#allocation9 + $0x44] sm:$0xf0]  ;;  %1183 = vmatpush.bf16.msra.mxu0 %v2333_v10  ;;  %v2508_v10 = vld [vmem:[#allocation9 + $0xb4] sm:$0xf] }
 0x12b   :  { %v2523_v17 = vld [vmem:[#allocation11 + $0x24] sm:$0xf0] }
 0x12c   :  { %2607 = vtanh.f32 %v478_v32  ;;  %v2161_v18 = vor.u32 %v2523_v17, %v2160_v16  ;;  %1089 = vmatpush.bf16.msrb.mxu2 %v2297_v15  ;;  %v2521_v32 = vld [vmem:[#allocation11 + $0x14] sm:$0xf0] }
 0x12d   :  { %v2153_v38 = vor.u32 %v2521_v32, %v2152_v31 }
 0x12e   :  { %783 = vmatpush.bf16.msra.mxu3 %v2161_v18  ;;  %v2514_v18 = vld [vmem:[#allocation9 + $0xe4] sm:$0xf] }
 0x12f   :  { %v431_v43 = vpop.f32.mrf.mxu0  ;;  %v2325_v20 = vor.u32 %v2514_v18, %v2322_v19  ;;  %v2226_v18 = vld [vmem:[#allocation9 + $0x28] sm:$0xf0] }
 0x130   :  { %v480_v44 = vpop.f32.mrf.mxu1  ;;  %v432_v49 = vadd.f32 %v3151_v9, %v431_v43  ;;  %1090 = vmatpush.bf16.msrb.mxu2 %v2289_v30  ;;  %v2491_v43 = vld [vmem:[#allocation9 + $0x24] sm:$0xf0]  ;;  %v2250_v30 = vld [vmem:[#allocation9 + $0x58] sm:$0xf0] }
 0x131   :  { %1184 = vmatpush.bf16.msra.mxu0 %v2325_v20 }
 0x132   :  { %v2608_v48 = vpop.eup %2607  ;;  %v481_v55 = vadd.f32 %v480_v44, %v432_v49  ;;  %v2280_v44 = vld [vmem:[#allocation9 + $0x90] sm:$0xf]  ;;  %784 = vmatpush.bf16.msra.mxu3 %v2153_v38  ;;  %v2314_v38 = vld [vmem:[#allocation9 + $0xd8] sm:$0xf0] }
 0x133   :  { %v507_v50 = vpack.c.bf16 %v2608_v48, %v2606_v47  ;;  %v2505_v47 = vld [vmem:[#allocation9 + $0x94] sm:$0xf0]  ;;  %v2225_v48 = vor.u32 %v2491_v43, %v2224_v41  ;;  %v2317_v41 = vor.u32 %v2512_v37, %v2314_v38  ;;  %v2218_v37 = vld [vmem:[#allocation9 + $0x18] sm:$0xf0] }
 0x134   :  { %2609 = vtanh.f32 %v481_v55  ;;  %v2281_v49 = vor.u32 %v2505_v47, %v2280_v44  ;;  %v2216_v55 = vld [vmem:[#allocation9 + $0x10] sm:$0xf] }
 0x135   :  { %615 = vmatmul.bf16.gmra.mxu2 %v507_v50  ;;  %v2144_v50 = vld [vmem:[#allocation11] sm:$0xf]  ;;  %1185 = vmatpush.bf16.msra.mxu0 %v2317_v41 }
 0x136   :  { %v2145_v54 = vor.u32 %v2519_v53, %v2144_v50  ;;  %1091 = vmatpush.bf16.msrb.mxu2 %v2281_v49  ;;  %v2242_v49 = vld [vmem:[#allocation9 + $0x48] sm:$0xf0] }
 0x137   :  { %v433_v56 = vpop.f32.mrf.mxu0 }
 0x138   :  { %v434_v58 = vadd.f32 %v3151_v9, %v433_v56  ;;  %v482_v0 = vpop.f32.mrf.mxu1  ;;  %v2241_v9 = vor.u32 %v2495_v12, %v2240_v11  ;;  %v2489_v56 = vld [vmem:[#allocation9 + $0x14] sm:$0xf0]  ;;  %785 = vmatpush.bf16.msra.mxu3 %v2145_v54  ;;  %v3174_v12 = vld [vmem:[%s3435_s4] ss:$0 sm:$0xff] }
 0x13a   :  { %v483_v3 = vadd.f32 %v482_v0, %v434_v58  ;;  %1039 = vmatpush.bf16.msrb.mxu1 %v2241_v9  ;;  %v2610_v24 = vpop.eup %2609  ;;  %v2217_v58 = vor.u32 %v2489_v56, %v2216_v55  ;;  %1092 = vmatpush.bf16.msrb.mxu2 %v2273_v62  ;;  %v2266_v0 = vld [vmem:[#allocation9 + $0x78] sm:$0xf0]  ;;  %v2258_v9 = vld [vmem:[#allocation9 + $0x68] sm:$0xf0]  ;;  %v2510_v56 = vld [vmem:[#allocation9 + $0xc4] sm:$0xf] }
 0x13b   :  { %v2269_v2 = vor.u32 %v2500_v63, %v2266_v0  ;;  %v2261_v14 = vor.u32 %v2498_v13, %v2258_v9 }
 0x13c   :  { %2611 = vtanh.f32 %v483_v3  ;;  %v2487_v3 = vld [vmem:[#allocation9 + $0x4] sm:$0xf0] }
 0x13d   :  { %v2209_v4 = vor.u32 %v2487_v3, %v2208_v1  ;;  %1134 = vmatpush.bf16.msrb.mxu3 %v2269_v2  ;;  %v2492_v1 = vld [vmem:[#allocation9 + $0x34] sm:$0xf]  ;;  %v2234_v2 = vld [vmem:[#allocation9 + $0x38] sm:$0xf0] }
 0x13e   :  { %1040 = vmatpush.bf16.msrb.mxu1 %v2233_v25  ;;  %v2237_v3 = vor.u32 %v2492_v1, %v2234_v2 }
 0x141   :  { %1135 = vmatpush.bf16.msrb.mxu3 %v2261_v14 }
 0x142   :  { %v2612_v29 = vpop.eup %2611  ;;  %1041 = vmatpush.bf16.msrb.mxu1 %v2225_v48  ;;  %v2494_v48 = vld [vmem:[#allocation9 + $0x44] sm:$0xf] }
 0x143   :  { %v508_v35 = vpack.c.bf16 %v2612_v29, %v2610_v24  ;;  %v2496_v29 = vld [vmem:[#allocation9 + $0x54] sm:$0xf]  ;;  %v2245_v50 = vor.u32 %v2494_v48, %v2242_v49 }
 0x144   :  { %v2253_v31 = vor.u32 %v2496_v29, %v2250_v30 }
 0x145   :  { %620 = vmatmul.bf16.gmra.mxu2 %v508_v35 }
 0x146   :  { %1042 = vmatpush.bf16.msrb.mxu1 %v2217_v58  ;;  %1136 = vmatpush.bf16.msrb.mxu3 %v2253_v31  ;;  %v2309_v58 = vor.u32 %v2510_v56, %v2306_v57  ;;  %v2210_v56 = vld [vmem:[#allocation9 + $0x8] sm:$0xf0]  ;;  %v2502_v57 = vld [vmem:[#allocation9 + $0x84] sm:$0xf] }
 0x148   :  { %1186 = vmatpush.bf16.msra.mxu0 %v2309_v58 }
 0x14a   :  { %1043 = vmatpush.bf16.msrb.mxu1 %v2209_v4  ;;  %1137 = vmatpush.bf16.msrb.mxu3 %v2245_v50 }
 0x14d   :  { %1044 = vmatmul.bf16.vlgmr.msrb.gmra.mxu1 %v3100_v21 }
 0x14e   :  { %1138 = vmatpush.bf16.msrb.mxu3 %v2237_v3 }
 0x155   :  { %1093 = vmatmul.bf16.vlgmr.msrb.gmra.mxu2 %v3102_v22 }
 0x158   :  { %v586_v11 = vpop.f32.mrf.mxu2 }
 0x159   :  { %v587_v15 = vadd.f32 %v3174_v12, %v586_v11  ;;  %v2298_v11 = vld [vmem:[#allocation9 + $0xb8] sm:$0xf0] }
 0x15a   :  { %v2301_v13 = vor.u32 %v2508_v10, %v2298_v11  ;;  %v2540_v10 = vld [vmem:[#allocation12 + $0x30] sm:$0xff] }
 0x15b   :  { %2613 = vtanh.f32 %v587_v15 }
 0x15c   :  { %1187 = vmatpush.bf16.msra.mxu0 %v2301_v13  ;;  %v2539_v13 = vld [vmem:[#allocation12 + $0x28] sm:$0xff] }
 0x15d   :  { %1049 = vmatmul.bf16.gmra.mxu1 %v3106_v27 }
 0x160   :  { %v588_v16 = vpop.f32.mrf.mxu2 }
 0x161   :  { %v589_v17 = vadd.f32 %v3174_v12, %v588_v16  ;;  %v2614_v23 = vpop.eup %2613 }
 0x163   :  { %2615 = vtanh.f32 %v589_v17  ;;  %v2490_v17 = vld [vmem:[#allocation9 + $0x24] sm:$0xf] }
 0x164   :  { %v2229_v19 = vor.u32 %v2490_v17, %v2226_v18  ;;  %v2537_v17 = vld [vmem:[#allocation12 + $0x18] sm:$0xff] }
 0x165   :  { %1098 = vmatmul.bf16.gmra.mxu2 %v3108_v28 }
 0x166   :  { %1139 = vmatpush.bf16.msrb.mxu3 %v2229_v19 }
 0x168   :  { %v591_v24 = vpop.f32.mrf.mxu2 }
 0x169   :  { %v2616_v25 = vpop.eup %2615  ;;  %v592_v32 = vadd.f32 %v3174_v12, %v591_v24 }
 0x16a   :  { %v674_v26 = vpack.c.bf16 %v2616_v25, %v2614_v23  ;;  %v2506_v25 = vld [vmem:[#allocation9 + $0xa4] sm:$0xf] }
 0x16b   :  { %2617 = vtanh.f32 %v592_v32 }
 0x16c   :  { %786 = vmatmul.bf16.vlgmr.msra.gmra.mxu3 %v674_v26  ;;  %835 = vmatmul.bf16.vlgmr.msrb.gmra.mxu0 %v674_v26  ;;  %v2290_v26 = vld [vmem:[#allocation9 + $0xa8] sm:$0xf0] }
 0x16d   :  { %1054 = vmatmul.bf16.gmra.mxu1 %v3112_v33  ;;  %v2293_v29 = vor.u32 %v2506_v25, %v2290_v26  ;;  %v2536_v25 = vld [vmem:[#allocation12 + $0x10] sm:$0xff]  ;;  %v2535_v26 = vld [vmem:[#allocation12 + $0x8] sm:$0xff] }
 0x16f   :  { %1188 = vmatpush.bf16.msra.mxu0 %v2293_v29 }
 0x170   :  { %v593_v35 = vpop.f32.mrf.mxu2 }
 0x171   :  { %v594_v36 = vadd.f32 %v3174_v12, %v593_v35  ;;  %v2618_v42 = vpop.eup %2617 }
 0x173   :  { %2619 = vtanh.f32 %v594_v36  ;;  %v2488_v36 = vld [vmem:[#allocation9 + $0x14] sm:$0xf] }
 0x174   :  { %v2221_v38 = vor.u32 %v2488_v36, %v2218_v37 }
 0x175   :  { %1103 = vmatmul.bf16.gmra.mxu2 %v3114_v34 }
 0x176   :  { %1140 = vmatpush.bf16.msrb.mxu3 %v2221_v38 }
 0x178   :  { %v596_v43 = vpop.f32.mrf.mxu2 }
 0x179   :  { %v2620_v44 = vpop.eup %2619  ;;  %v597_v53 = vadd.f32 %v3174_v12, %v596_v43 }
 0x17a   :  { %v675_v47 = vpack.c.bf16 %v2620_v44, %v2618_v42  ;;  %v2504_v44 = vld [vmem:[#allocation9 + $0x94] sm:$0xf] }
 0x17b   :  { %2621 = vtanh.f32 %v597_v53 }
 0x17c   :  { %791 = vmatmul.bf16.gmra.mxu3 %v675_v47  ;;  %840 = vmatmul.bf16.gmra.mxu0 %v675_v47  ;;  %v2282_v47 = vld [vmem:[#allocation9 + $0x98] sm:$0xf0] }
 0x17d   :  { %1059 = vmatmul.bf16.gmra.mxu1 %v3118_v39  ;;  %v2285_v48 = vor.u32 %v2504_v44, %v2282_v47 }
 0x17f   :  { %1189 = vmatpush.bf16.msra.mxu0 %v2285_v48 }
 0x180   :  { %v598_v54 = vpop.f32.mrf.mxu2 }
 0x181   :  { %v599_v55 = vadd.f32 %v3174_v12, %v598_v54  ;;  %v2622_v59 = vpop.eup %2621 }
 0x183   :  { %2623 = vtanh.f32 %v599_v55  ;;  %v2486_v55 = vld [vmem:[#allocation9 + $0x4] sm:$0xf] }
 0x184   :  { %v2213_v58 = vor.u32 %v2486_v55, %v2210_v56 }
 0x185   :  { %1108 = vmatmul.bf16.gmra.mxu2 %v3120_v40 }
 0x186   :  { %1141 = vmatpush.bf16.msrb.mxu3 %v2213_v58 }
 0x188   :  { %v601_v62 = vpop.f32.mrf.mxu2 }
 0x189   :  { %v2624_v63 = vpop.eup %2623  ;;  %v602_v4 = vadd.f32 %v3174_v12, %v601_v62  ;;  %v2541_v62 = vld [vmem:[#allocation12 + $0x38] sm:$0xff] }
 0x18a   :  { %v676_v0 = vpack.c.bf16 %v2624_v63, %v2622_v59  ;;  %v2274_v59 = vld [vmem:[#allocation9 + $0x88] sm:$0xf0]  ;;  %1450 = vmatpush.bf16.msra.mxu1 %v2541_v62 }
 0x18b   :  { %2625 = vtanh.f32 %v602_v4 }
 0x18c   :  { %796 = vmatmul.bf16.gmra.mxu3 %v676_v0  ;;  %845 = vmatmul.bf16.gmra.mxu0 %v676_v0  ;;  %v2277_v0 = vor.u32 %v2502_v57, %v2274_v59 }
 0x18d   :  { %1064 = vmatmul.bf16.gmra.mxu1 %v3124_v45 }
 0x18e   :  { %1190 = vmatpush.bf16.msra.mxu0 %v2277_v0  ;;  %1451 = vmatpush.bf16.msra.mxu1 %v2540_v10 }
 0x190   :  { %v603_v5 = vpop.f32.mrf.mxu2 }
 0x191   :  { %v604_v8 = vadd.f32 %v3174_v12, %v603_v5  ;;  %v2626_v9 = vpop.eup %2625 }
 0x192   :  { %1452 = vmatpush.bf16.msra.mxu1 %v2539_v13 }
 0x193   :  { %2627 = vtanh.f32 %v604_v8 }
 0x195   :  { %1113 = vmatmul.bf16.gmra.mxu2 %v3126_v46 }
 0x198   :  { %v606_v14 = vpop.f32.mrf.mxu2 }
 0x199   :  { %v2628_v15 = vpop.eup %2627  ;;  %v607_v20 = vadd.f32 %v3174_v12, %v606_v14 }
 0x19a   :  { %v677_v16 = vpack.c.bf16 %v2628_v15, %v2626_v9 }
 0x19b   :  { %2629 = vtanh.f32 %v607_v20 }
 0x19c   :  { %801 = vmatmul.bf16.gmra.mxu3 %v677_v16  ;;  %850 = vmatmul.bf16.gmra.mxu0 %v677_v16  ;;  %v2538_v16 = vld [vmem:[#allocation12 + $0x20] sm:$0xff] }
 0x19d   :  { %1069 = vmatmul.bf16.gmra.mxu1 %v3130_v51 }
 0x19e   :  { %1453 = vmatpush.bf16.msra.mxu1 %v2538_v16 }
 0x1a0   :  { %v608_v23 = vpop.f32.mrf.mxu2 }
 0x1a1   :  { %v609_v24 = vadd.f32 %v3174_v12, %v608_v23  ;;  %v2630_v30 = vpop.eup %2629 }
 0x1a2   :  { %1454 = vmatpush.bf16.msra.mxu1 %v2537_v17 }
 0x1a3   :  { %2631 = vtanh.f32 %v609_v24 }
 0x1a5   :  { %1118 = vmatmul.bf16.gmra.mxu2 %v3132_v52 }
 0x1a6   :  { %1455 = vmatpush.bf16.msra.mxu1 %v2536_v25 }
 0x1a8   :  { %v611_v31 = vpop.f32.mrf.mxu2 }
 0x1a9   :  { %v2632_v32 = vpop.eup %2631  ;;  %v612_v41 = vadd.f32 %v3174_v12, %v611_v31 }
 0x1aa   :  { %v678_v35 = vpack.c.bf16 %v2632_v32, %v2630_v30  ;;  %1456 = vmatpush.bf16.msra.mxu1 %v2535_v26  ;;  %v2549_v32 = vld [vmem:[#allocation12 + $0x78] sm:$0xff] }
 0x1ab   :  { %2633 = vtanh.f32 %v612_v41  ;;  %1499 = vmatpush.bf16.msra.mxu2 %v2549_v32 }
 0x1ac   :  { %806 = vmatmul.bf16.gmra.mxu3 %v678_v35  ;;  %855 = vmatmul.bf16.gmra.mxu0 %v678_v35 }
 0x1ad   :  { %1074 = vmatmul.bf16.gmra.mxu1 %v3136_v60 }
 0x1b0   :  { %v613_v42 = vpop.f32.mrf.mxu2 }
 0x1b1   :  { %v614_v43 = vadd.f32 %v3174_v12, %v613_v42  ;;  %v2634_v49 = vpop.eup %2633 }
 0x1b3   :  { %2635 = vtanh.f32 %v614_v43  ;;  %v3215_v43 = vld [vmem:[%s3438_s7] sm:$0x3] }
 0x1b4   :  { %v3218_v47 = vperm.slane %v3215_v43, 0 }
 0x1b5   :  { %1123 = vmatmul.bf16.gmra.mxu2 %v3138_v61 }
 0x1b8   :  { %v616_v50 = vpop.f32.mrf.mxu2 }
 0x1b9   :  { %v2636_v53 = vpop.eup %2635  ;;  %v617_v63 = vadd.f32 %v3174_v12, %v616_v50  ;;  %v2548_v50 = vld [vmem:[#allocation12 + $0x70] sm:$0xff] }
 0x1ba   :  { %v679_v54 = vpack.c.bf16 %v2636_v53, %v2634_v49  ;;  %1500 = vmatpush.bf16.msra.mxu2 %v2548_v50 }
 0x1bb   :  { %2637 = vtanh.f32 %v617_v63 }
 0x1bc   :  { %811 = vmatmul.bf16.gmra.mxu3 %v679_v54  ;;  %860 = vmatmul.bf16.gmra.mxu0 %v679_v54 }
 0x1bd   :  { %1079 = vmatmul.bf16.gmra.mxu1 %v3142_v6 }
 0x1c0   :  { %v618_v1 = vpop.f32.mrf.mxu2 }
 0x1c1   :  { %v619_v2 = vadd.f32 %v3174_v12, %v618_v1  ;;  %v2638_v3 = vpop.eup %2637 }
 0x1c3   :  { %2639 = vtanh.f32 %v619_v2 }
 0x1c5   :  { %1128 = vmatmul.bf16.gmra.mxu2 %v3144_v7 }
 0x1c8   :  { %v621_v4 = vpop.f32.mrf.mxu2 }
 0x1c9   :  { %v2640_v5 = vpop.eup %2639  ;;  %v622_v11 = vadd.f32 %v3174_v12, %v621_v4 }
 0x1ca   :  { %v680_v8 = vpack.c.bf16 %v2640_v5, %v2638_v3  ;;  %v1045_v14 = vpop.f32.mrf.mxu1 }
 0x1cb   :  { %2641 = vtanh.f32 %v622_v11 }
 0x1cc   :  { %816 = vmatmul.bf16.gmra.mxu3 %v680_v8  ;;  %865 = vmatmul.bf16.gmra.mxu0 %v680_v8  ;;  %v2547_v8 = vld [vmem:[#allocation12 + $0x68] sm:$0xff] }
 0x1cd   :  { %1501 = vmatpush.bf16.msra.mxu2 %v2547_v8 }
 0x1d0   :  { %v623_v9 = vpop.f32.mrf.mxu2 }
 0x1d1   :  { %v624_v15 = vadd.f32 %v3174_v12, %v623_v9  ;;  %v2642_v18 = vpop.eup %2641  ;;  %v2534_v12 = vld [vmem:[#allocation12] sm:$0xff] }
 0x1d2   :  { %v1047_v23 = vpop.f32.mrf.mxu1  ;;  %1457 = vmatpush.bf16.msra.mxu1 %v2534_v12 }
 0x1d3   :  { %2643 = vtanh.f32 %v624_v15 }
 0x1d8   :  { %v1094_v19 = vpop.f32.mrf.mxu2 }
 0x1d9   :  { %v2644_v20 = vpop.eup %2643 }
 0x1da   :  { %v681_v24 = vpack.c.bf16 %v2644_v20, %v2642_v18  ;;  %v1050_v30 = vpop.f32.mrf.mxu1 }
 0x1dc   :  { %821 = vmatmul.bf16.gmra.mxu3 %v681_v24  ;;  %870 = vmatmul.bf16.gmra.mxu0 %v681_v24 }
 0x1e0   :  { %v1096_v29 = vpop.f32.mrf.mxu2 }
 0x1e2   :  { %v1052_v36 = vpop.f32.mrf.mxu1 }
 0x1e8   :  { %v1099_v31 = vpop.f32.mrf.mxu2 }
 0x1e9   :  { %v3206_v35 = vpop.f32.mrf.mxu0 }
 0x1ea   :  { %v1055_v49 = vpop.f32.mrf.mxu1 }
 0x1ec   :  { %1142 = vmatmul.bf16.vlgmr.msrb.gmra.mxu3 %v3100_v21  ;;  %1191 = vmatmul.bf16.vlgmr.msra.gmra.mxu0 %v3102_v22 }
 0x1ef   :  { %v787_v37 = vpop.f32.mrf.mxu3 }
 0x1f0   :  { %v1101_v38 = vpop.f32.mrf.mxu2  ;;  %v1046_v41 = vadd.f32 %v1045_v14, %v787_v37 }
 0x1f1   :  { %v3210_v42 = vpop.f32.mrf.mxu0 }
 0x1f2   :  { %v1095_v44 = vadd.f32 %v1094_v19, %v1046_v41  ;;  %v1057_v62 = vpop.f32.mrf.mxu1 }
 0x1f4   :  { %v1238_v22 = vadd.f32 %v3218_v47, %v1095_v44 }
 0x1f6   :  { %2645 = vtanh.f32 %v1238_v22  ;;  %v2545_v22 = vld [vmem:[#allocation12 + $0x58] sm:$0xff] }
 0x1f7   :  { %v789_v48 = vpop.f32.mrf.mxu3 }
 0x1f8   :  { %v1048_v21 = vadd.f32 %v1047_v23, %v789_v48  ;;  %v1104_v54 = vpop.f32.mrf.mxu2 }
 0x1f9   :  { %v3221_v53 = vpop.f32.mrf.mxu0 }
 0x1fa   :  { %v1097_v55 = vadd.f32 %v1096_v29, %v1048_v21  ;;  %v1060_v11 = vpop.f32.mrf.mxu1  ;;  %v2546_v29 = vld [vmem:[#allocation12 + $0x60] sm:$0xff] }
 0x1fb   :  { %1502 = vmatpush.bf16.msra.mxu2 %v2546_v29 }
 0x1fc   :  { %v1240_v56 = vadd.f32 %v3218_v47, %v1097_v55  ;;  %1147 = vmatmul.bf16.gmra.mxu3 %v3106_v27  ;;  %1196 = vmatmul.bf16.gmra.mxu0 %v3108_v28  ;;  %v2646_v63 = vpop.eup %2645 }
 0x1fe   :  { %2647 = vtanh.f32 %v1240_v56 }
 0x1ff   :  { %v792_v57 = vpop.f32.mrf.mxu3  ;;  %1503 = vmatpush.bf16.msra.mxu2 %v2545_v22 }
 0x200   :  { %v1051_v58 = vadd.f32 %v1050_v30, %v792_v57  ;;  %v1106_v0 = vpop.f32.mrf.mxu2 }
 0x201   :  { %v3226_v59 = vpop.f32.mrf.mxu0 }
 0x202   :  { %v1100_v3 = vadd.f32 %v1099_v31, %v1051_v58  ;;  %v1062_v23 = vpop.f32.mrf.mxu1 }
 0x204   :  { %v2648_v1 = vpop.eup %2647  ;;  %v1242_v27 = vadd.f32 %v3218_v47, %v1100_v3 }
 0x205   :  { %v1302_v2 = vpack.c.bf16 %v2648_v1, %v2646_v63 }
 0x206   :  { %2649 = vtanh.f32 %v1242_v27 }
 0x207   :  { %v794_v4 = vpop.f32.mrf.mxu3  ;;  %1458 = vmatmul.bf16.vlgmr.msra.gmra.mxu1 %v1302_v2 }
 0x208   :  { %v1053_v5 = vadd.f32 %v1052_v36, %v794_v4  ;;  %v1109_v9 = vpop.f32.mrf.mxu2 }
 0x209   :  { %v3229_v10 = vpop.f32.mrf.mxu0 }
 0x20a   :  { %v1102_v28 = vadd.f32 %v1101_v38, %v1053_v5  ;;  %v1065_v32 = vpop.f32.mrf.mxu1 }
 0x20c   :  { %v1244_v13 = vadd.f32 %v3218_v47, %v1102_v28  ;;  %1152 = vmatmul.bf16.gmra.mxu3 %v3112_v33  ;;  %1201 = vmatmul.bf16.gmra.mxu0 %v3114_v34  ;;  %v2650_v17 = vpop.eup %2649  ;;  %v2544_v28 = vld [vmem:[#allocation12 + $0x50] sm:$0xff] }
 0x20d   :  { %1504 = vmatpush.bf16.msra.mxu2 %v2544_v28 }
 0x20e   :  { %2651 = vtanh.f32 %v1244_v13 }
 0x20f   :  { %v797_v14 = vpop.f32.mrf.mxu3 }
 0x210   :  { %v1056_v15 = vadd.f32 %v1055_v49, %v797_v14  ;;  %v1111_v25 = vpop.f32.mrf.mxu2 }
 0x211   :  { %v3234_v16 = vpop.f32.mrf.mxu0 }
 0x212   :  { %v1105_v19 = vadd.f32 %v1104_v54, %v1056_v15 }
 0x214   :  { %v2652_v18 = vpop.eup %2651  ;;  %v1246_v33 = vadd.f32 %v3218_v47, %v1105_v19 }
 0x215   :  { %v1304_v20 = vpack.c.bf16 %v2652_v18, %v2650_v17 }
 0x216   :  { %2653 = vtanh.f32 %v1246_v33  ;;  %v2543_v33 = vld [vmem:[#allocation12 + $0x48] sm:$0xff] }
 0x217   :  { %v799_v24 = vpop.f32.mrf.mxu3  ;;  %1463 = vmatmul.bf16.gmra.mxu1 %v1304_v20  ;;  %1505 = vmatpush.bf16.msra.mxu2 %v2543_v33 }
 0x218   :  { %v1058_v26 = vadd.f32 %v1057_v62, %v799_v24  ;;  %v1114_v38 = vpop.f32.mrf.mxu2 }
 0x219   :  { %v3237_v34 = vpop.f32.mrf.mxu0 }
 0x21a   :  { %v1107_v12 = vadd.f32 %v1106_v0, %v1058_v26 }
 0x21c   :  { %v1248_v30 = vadd.f32 %v3218_v47, %v1107_v12  ;;  %1157 = vmatmul.bf16.gmra.mxu3 %v3118_v39  ;;  %1206 = vmatmul.bf16.gmra.mxu0 %v3120_v40  ;;  %v2654_v41 = vpop.eup %2653  ;;  %v1067_v40 = vpop.f32.mrf.mxu1 }
 0x21e   :  { %2655 = vtanh.f32 %v1248_v30 }
 0x21f   :  { %v802_v31 = vpop.f32.mrf.mxu3 }
 0x220   :  { %v1061_v36 = vadd.f32 %v1060_v11, %v802_v31  ;;  %v1116_v56 = vpop.f32.mrf.mxu2 }
 0x221   :  { %v3242_v37 = vpop.f32.mrf.mxu0 }
 0x222   :  { %v1110_v48 = vadd.f32 %v1109_v9, %v1061_v36 }
 0x224   :  { %v2656_v44 = vpop.eup %2655  ;;  %v1250_v39 = vadd.f32 %v3218_v47, %v1110_v48  ;;  %v1070_v1 = vpop.f32.mrf.mxu1 }
 0x225   :  { %v1306_v49 = vpack.c.bf16 %v2656_v44, %v2654_v41 }
 0x226   :  { %2657 = vtanh.f32 %v1250_v39 }
 0x227   :  { %v804_v21 = vpop.f32.mrf.mxu3  ;;  %1468 = vmatmul.bf16.gmra.mxu1 %v1306_v49 }
 0x228   :  { %v1063_v50 = vadd.f32 %v1062_v23, %v804_v21  ;;  %v1119_v5 = vpop.f32.mrf.mxu2 }
 0x229   :  { %v3245_v54 = vpop.f32.mrf.mxu0 }
 0x22a   :  { %v1112_v55 = vadd.f32 %v1111_v25, %v1063_v50 }
 0x22c   :  { %v1252_v57 = vadd.f32 %v3218_v47, %v1112_v55  ;;  %1162 = vmatmul.bf16.gmra.mxu3 %v3124_v45  ;;  %1211 = vmatmul.bf16.gmra.mxu0 %v3126_v46  ;;  %v2658_v0 = vpop.eup %2657  ;;  %v1072_v9 = vpop.f32.mrf.mxu1 }
 0x22e   :  { %2659 = vtanh.f32 %v1252_v57 }
 0x22f   :  { %v807_v58 = vpop.f32.mrf.mxu3 }
 0x230   :  { %v1066_v62 = vadd.f32 %v1065_v32, %v807_v58  ;;  %v1121_v15 = vpop.f32.mrf.mxu2  ;;  %v2542_v58 = vld [vmem:[#allocation12 + $0x40] sm:$0xff] }
 0x231   :  { %v3250_v63 = vpop.f32.mrf.mxu0  ;;  %1506 = vmatpush.bf16.msra.mxu2 %v2542_v58 }
 0x232   :  { %v1115_v3 = vadd.f32 %v1114_v38, %v1066_v62 }
 0x234   :  { %v2660_v2 = vpop.eup %2659  ;;  %v1254_v45 = vadd.f32 %v3218_v47, %v1115_v3  ;;  %v1075_v26 = vpop.f32.mrf.mxu1 }
 0x235   :  { %v1308_v4 = vpack.c.bf16 %v2660_v2, %v2658_v0 }
 0x236   :  { %2661 = vtanh.f32 %v1254_v45 }
 0x237   :  { %v809_v8 = vpop.f32.mrf.mxu3  ;;  %1473 = vmatmul.bf16.gmra.mxu1 %v1308_v4 }
 0x238   :  { %v1068_v27 = vadd.f32 %v1067_v40, %v809_v8  ;;  %v1124_v12 = vpop.f32.mrf.mxu2 }
 0x239   :  { %v3253_v11 = vpop.f32.mrf.mxu0 }
 0x23a   :  { %v1117_v46 = vadd.f32 %v1116_v56, %v1068_v27 }
 0x23c   :  { %v1256_v13 = vadd.f32 %v3218_v47, %v1117_v46  ;;  %1167 = vmatmul.bf16.gmra.mxu3 %v3130_v51  ;;  %1216 = vmatmul.bf16.gmra.mxu0 %v3132_v52  ;;  %v2662_v19 = vpop.eup %2661  ;;  %v1077_v41 = vpop.f32.mrf.mxu1 }
 0x23e   :  { %2663 = vtanh.f32 %v1256_v13 }
 0x23f   :  { %v812_v14 = vpop.f32.mrf.mxu3 }
 0x240   :  { %v1071_v17 = vadd.f32 %v1070_v1, %v812_v14  ;;  %v1126_v48 = vpop.f32.mrf.mxu2 }
 0x241   :  { %v3258_v18 = vpop.f32.mrf.mxu0 }
 0x242   :  { %v1120_v23 = vadd.f32 %v1119_v5, %v1071_v17 }
 0x244   :  { %v2664_v20 = vpop.eup %2663  ;;  %v1258_v51 = vadd.f32 %v3218_v47, %v1120_v23  ;;  %v1080_v55 = vpop.f32.mrf.mxu1  ;;  %v3280_v23 = vperm.slane %v3215_v43, 1 }
 0x245   :  { %v1310_v24 = vpack.c.bf16 %v2664_v20, %v2662_v19 }
 0x246   :  { %2665 = vtanh.f32 %v1258_v51 }
 0x247   :  { %v814_v25 = vpop.f32.mrf.mxu3  ;;  %1478 = vmatmul.bf16.gmra.mxu1 %v1310_v24 }
 0x248   :  { %v1073_v29 = vadd.f32 %v1072_v9, %v814_v25  ;;  %v1129_v57 = vpop.f32.mrf.mxu2 }
 0x249   :  { %v3261_v52 = vpop.f32.mrf.mxu0 }
 0x24a   :  { %v1122_v30 = vadd.f32 %v1121_v15, %v1073_v29 }
 0x24c   :  { %v1260_v31 = vadd.f32 %v3218_v47, %v1122_v30  ;;  %1172 = vmatmul.bf16.gmra.mxu3 %v3136_v60  ;;  %1221 = vmatmul.bf16.gmra.mxu0 %v3138_v61  ;;  %v2666_v44 = vpop.eup %2665  ;;  %v1082_v5 = vpop.f32.mrf.mxu1 }
 0x24e   :  { %2667 = vtanh.f32 %v1260_v31 }
 0x24f   :  { %v817_v32 = vpop.f32.mrf.mxu3 }
 0x250   :  { %v1076_v36 = vadd.f32 %v1075_v26, %v817_v32  ;;  %v1131_v28 = vpop.f32.mrf.mxu2 }
 0x251   :  { %v3266_v38 = vpop.f32.mrf.mxu0 }
 0x252   :  { %v1125_v21 = vadd.f32 %v1124_v12, %v1076_v36 }
 0x254   :  { %v2668_v49 = vpop.eup %2667  ;;  %v1262_v40 = vadd.f32 %v3218_v47, %v1125_v21 }
 0x255   :  { %v1312_v50 = vpack.c.bf16 %v2668_v49, %v2666_v44 }
 0x256   :  { %2669 = vtanh.f32 %v1262_v40 }
 0x257   :  { %v819_v22 = vpop.f32.mrf.mxu3  ;;  %1483 = vmatmul.bf16.gmra.mxu1 %v1312_v50 }
 0x258   :  { %v1078_v39 = vadd.f32 %v1077_v41, %v819_v22  ;;  %v2556_v22 = vld [vmem:[#allocation14 + $0x30] sm:$0xff] }
 0x259   :  { %v3269_v60 = vpop.f32.mrf.mxu0 }
 0x25a   :  { %v1127_v61 = vadd.f32 %v1126_v48, %v1078_v39 }
 0x25c   :  { %v1264_v56 = vadd.f32 %v3218_v47, %v1127_v61  ;;  %1177 = vmatmul.bf16.gmra.mxu3 %v3142_v6  ;;  %1226 = vmatmul.bf16.gmra.mxu0 %v3144_v7  ;;  %v2670_v2 = vpop.eup %2669 }
 0x25e   :  { %2671 = vtanh.f32 %v1264_v56 }
 0x25f   :  { %v822_v62 = vpop.f32.mrf.mxu3 }
 0x260   :  { %v1081_v0 = vadd.f32 %v1080_v55, %v822_v62 }
 0x261   :  { %v3274_v1 = vpop.f32.mrf.mxu0 }
 0x262   :  { %v1130_v4 = vadd.f32 %v1129_v57, %v1081_v0 }
 0x264   :  { %v2672_v3 = vpop.eup %2671  ;;  %v1266_v7 = vadd.f32 %v3218_v47, %v1130_v4  ;;  %v2555_v4 = vld [vmem:[#allocation14 + $0x28] sm:$0xff] }
 0x265   :  { %v1314_v8 = vpack.c.bf16 %v2672_v3, %v2670_v2 }
 0x266   :  { %2673 = vtanh.f32 %v1266_v7 }
 0x267   :  { %v824_v27 = vpop.f32.mrf.mxu3  ;;  %1488 = vmatmul.bf16.gmra.mxu1 %v1314_v8 }
 0x268   :  { %v1083_v6 = vadd.f32 %v1082_v5, %v824_v27 }
 0x269   :  { %v1192_v45 = vpop.f32.mrf.mxu0 }
 0x26a   :  { %v1132_v46 = vadd.f32 %v1131_v28, %v1083_v6 }
 0x26c   :  { %v1268_v13 = vadd.f32 %v3218_v47, %v1132_v46  ;;  %v2674_v17 = vpop.eup %2673 }
 0x26e   :  { %2675 = vtanh.f32 %v1268_v13 }
 0x26f   :  { %v1143_v9 = vpop.f32.mrf.mxu3 }
 0x270   :  { %v1144_v14 = vadd.f32 %v1143_v9, %v3206_v35  ;;  %v2557_v35 = vld [vmem:[#allocation14 + $0x38] sm:$0xff] }
 0x271   :  { %v1194_v15 = vpop.f32.mrf.mxu0  ;;  %1640 = vmatpush.bf16.msra.mxu3 %v2557_v35 }
 0x272   :  { %v1193_v20 = vadd.f32 %v1192_v45, %v1144_v14 }
 0x274   :  { %v2676_v19 = vpop.eup %2675  ;;  %v1239_v29 = vadd.f32 %v3280_v23, %v1193_v20 }
 0x275   :  { %v1316_v24 = vpack.c.bf16 %v2676_v19, %v2674_v17  ;;  %1641 = vmatpush.bf16.msra.mxu3 %v2556_v22 }
 0x276   :  { %2677 = vtanh.f32 %v1239_v29 }
 0x277   :  { %v1145_v25 = vpop.f32.mrf.mxu3  ;;  %1493 = vmatmul.bf16.gmra.mxu1 %v1316_v24 }
 0x278   :  { %v1146_v26 = vadd.f32 %v1145_v25, %v3210_v42 }
 0x279   :  { %v1197_v47 = vpop.f32.mrf.mxu0  ;;  %1642 = vmatpush.bf16.msra.mxu3 %v2555_v4 }
 0x27a   :  { %v1195_v33 = vadd.f32 %v1194_v15, %v1146_v26  ;;  %v2554_v15 = vld [vmem:[#allocation14 + $0x20] sm:$0xff] }
 0x27c   :  { %v1241_v51 = vadd.f32 %v3280_v23, %v1195_v33  ;;  %v2678_v31 = vpop.eup %2677 }
 0x27d   :  { %1643 = vmatpush.bf16.msra.mxu3 %v2554_v15 }
 0x27e   :  { %2679 = vtanh.f32 %v1241_v51 }
 0x27f   :  { %v1148_v12 = vpop.f32.mrf.mxu3 }
 0x280   :  { %v1149_v30 = vadd.f32 %v1148_v12, %v3221_v53  ;;  %v2553_v12 = vld [vmem:[#allocation14 + $0x18] sm:$0xff] }
 0x281   :  { %v1199_v43 = vpop.f32.mrf.mxu0  ;;  %1644 = vmatpush.bf16.msra.mxu3 %v2553_v12 }
 0x282   :  { %v1198_v36 = vadd.f32 %v1197_v47, %v1149_v30 }
 0x284   :  { %v2680_v32 = vpop.eup %2679  ;;  %v1243_v48 = vadd.f32 %v3280_v23, %v1198_v36 }
 0x285   :  { %v1303_v41 = vpack.c.bf16 %v2680_v32, %v2678_v31 }
 0x286   :  { %2681 = vtanh.f32 %v1243_v48 }
 0x287   :  { %v1150_v44 = vpop.f32.mrf.mxu3  ;;  %1507 = vmatmul.bf16.vlgmr.msra.gmra.mxu2 %v1303_v41 }
 0x288   :  { %v1151_v42 = vadd.f32 %v1150_v44, %v3226_v59 }
 0x289   :  { %v1202_v49 = vpop.f32.mrf.mxu0 }
 0x28a   :  { %v1200_v21 = vadd.f32 %v1199_v43, %v1151_v42 }
 0x28c   :  { %v1245_v50 = vadd.f32 %v3280_v23, %v1200_v21  ;;  %v2682_v61 = vpop.eup %2681 }
 0x28e   :  { %2683 = vtanh.f32 %v1245_v50  ;;  %v2552_v50 = vld [vmem:[#allocation14 + $0x10] sm:$0xff] }
 0x28f   :  { %v1153_v39 = vpop.f32.mrf.mxu3  ;;  %1645 = vmatpush.bf16.msra.mxu3 %v2552_v50 }
 0x290   :  { %v1154_v53 = vadd.f32 %v1153_v39, %v3229_v10 }
 0x291   :  { %v1204_v40 = vpop.f32.mrf.mxu0 }
 0x292   :  { %v1203_v56 = vadd.f32 %v1202_v49, %v1154_v53 }
 0x294   :  { %v2684_v55 = vpop.eup %2683  ;;  %v1247_v62 = vadd.f32 %v3280_v23, %v1203_v56 }
 0x295   :  { %v1305_v57 = vpack.c.bf16 %v2684_v55, %v2682_v61 }
 0x296   :  { %2685 = vtanh.f32 %v1247_v62  ;;  %v2551_v62 = vld [vmem:[#allocation14 + $0x8] sm:$0xff] }
 0x297   :  { %v1155_v58 = vpop.f32.mrf.mxu3  ;;  %1512 = vmatmul.bf16.gmra.mxu2 %v1305_v57  ;;  %1646 = vmatpush.bf16.msra.mxu3 %v2551_v62 }
 0x298   :  { %v1156_v59 = vadd.f32 %v1155_v58, %v3234_v16 }
 0x299   :  { %v1207_v0 = vpop.f32.mrf.mxu0 }
 0x29a   :  { %v1205_v2 = vadd.f32 %v1204_v40, %v1156_v59 }
 0x29c   :  { %v1249_v3 = vadd.f32 %v3280_v23, %v1205_v2  ;;  %v2686_v27 = vpop.eup %2685 }
 0x29e   :  { %2687 = vtanh.f32 %v1249_v3 }
 0x29f   :  { %v1158_v5 = vpop.f32.mrf.mxu3 }
 0x2a0   :  { %v1159_v10 = vadd.f32 %v1158_v5, %v3237_v34 }
 0x2a1   :  { %v1209_v8 = vpop.f32.mrf.mxu0 }
 0x2a2   :  { %v1208_v6 = vadd.f32 %v1207_v0, %v1159_v10 }
 0x2a4   :  { %v2688_v28 = vpop.eup %2687  ;;  %v1251_v46 = vadd.f32 %v3280_v23, %v1208_v6 }
 0x2a5   :  { %v1307_v7 = vpack.c.bf16 %v2688_v28, %v2686_v27 }
 0x2a6   :  { %2689 = vtanh.f32 %v1251_v46 }
 0x2a7   :  { %v1160_v45 = vpop.f32.mrf.mxu3  ;;  %1517 = vmatmul.bf16.gmra.mxu2 %v1307_v7 }
 0x2a8   :  { %v1161_v16 = vadd.f32 %v1160_v45, %v3242_v37 }
 0x2a9   :  { %v1212_v13 = vpop.f32.mrf.mxu0 }
 0x2aa   :  { %v1210_v9 = vadd.f32 %v1209_v8, %v1161_v16  ;;  %v2550_v16 = vld [vmem:[#allocation14] sm:$0xff] }
 0x2ab   :  { %1647 = vmatpush.bf16.msra.mxu3 %v2550_v16 }
 0x2ac   :  { %v1253_v14 = vadd.f32 %v3280_v23, %v1210_v9  ;;  %v2690_v20 = vpop.eup %2689 }
 0x2ae   :  { %2691 = vtanh.f32 %v1253_v14 }
 0x2af   :  { %v1163_v17 = vpop.f32.mrf.mxu3 }
 0x2b0   :  { %v1164_v34 = vadd.f32 %v1163_v17, %v3245_v54 }
 0x2b1   :  { %v1214_v19 = vpop.f32.mrf.mxu0 }
 0x2b2   :  { %v1213_v25 = vadd.f32 %v1212_v13, %v1164_v34 }
 0x2b4   :  { %v2692_v24 = vpop.eup %2691  ;;  %v1255_v47 = vadd.f32 %v3280_v23, %v1213_v25 }
 0x2b5   :  { %v1309_v26 = vpack.c.bf16 %v2692_v24, %v2690_v20 }
 0x2b6   :  { %2693 = vtanh.f32 %v1255_v47 }
 0x2b7   :  { %v1165_v29 = vpop.f32.mrf.mxu3  ;;  %1522 = vmatmul.bf16.gmra.mxu2 %v1309_v26 }
 0x2b8   :  { %v1166_v37 = vadd.f32 %v1165_v29, %v3250_v63 }
 0x2b9   :  { %v1217_v33 = vpop.f32.mrf.mxu0 }
 0x2ba   :  { %v1215_v51 = vadd.f32 %v1214_v19, %v1166_v37 }
 0x2bc   :  { %v1257_v35 = vadd.f32 %v3280_v23, %v1215_v51  ;;  %v2694_v31 = vpop.eup %2693 }
 0x2be   :  { %2695 = vtanh.f32 %v1257_v35 }
 0x2bf   :  { %v1168_v30 = vpop.f32.mrf.mxu3 }
 0x2c0   :  { %v1169_v54 = vadd.f32 %v1168_v30, %v3253_v11 }
 0x2c1   :  { %v1219_v43 = vpop.f32.mrf.mxu0 }
 0x2c2   :  { %v1218_v36 = vadd.f32 %v1217_v33, %v1169_v54 }
 0x2c4   :  { %v2696_v32 = vpop.eup %2695  ;;  %v1259_v42 = vadd.f32 %v3280_v23, %v1218_v36 }
 0x2c5   :  { %v1311_v41 = vpack.c.bf16 %v2696_v32, %v2694_v31 }
 0x2c6   :  { %2697 = vtanh.f32 %v1259_v42 }
 0x2c7   :  { %v1170_v44 = vpop.f32.mrf.mxu3  ;;  %1527 = vmatmul.bf16.gmra.mxu2 %v1311_v41 }
 0x2c8   :  { %v1171_v63 = vadd.f32 %v1170_v44, %v3258_v18 }
 0x2c9   :  { %v1222_v49 = vpop.f32.mrf.mxu0 }
 0x2ca   :  { %v1220_v48 = vadd.f32 %v1219_v43, %v1171_v63 }
 0x2cc   :  { %v1261_v21 = vadd.f32 %v3280_v23, %v1220_v48  ;;  %v2698_v39 = vpop.eup %2697 }
 0x2ce   :  { %2699 = vtanh.f32 %v1261_v21 }
 0x2cf   :  { %v1173_v22 = vpop.f32.mrf.mxu3 }
 0x2d0   :  { %v1174_v11 = vadd.f32 %v1173_v22, %v3261_v52 }
 0x2d1   :  { %v1224_v61 = vpop.f32.mrf.mxu0 }
 0x2d2   :  { %v1223_v40 = vadd.f32 %v1222_v49, %v1174_v11 }
 0x2d4   :  { %v2700_v53 = vpop.eup %2699  ;;  %v1263_v57 = vadd.f32 %v3280_v23, %v1223_v40 }
 0x2d5   :  { %v1313_v55 = vpack.c.bf16 %v2700_v53, %v2698_v39 }
 0x2d6   :  { %2701 = vtanh.f32 %v1263_v57 }
 0x2d7   :  { %v1175_v56 = vpop.f32.mrf.mxu3  ;;  %1532 = vmatmul.bf16.gmra.mxu2 %v1313_v55 }
 0x2d8   :  { %v1176_v18 = vadd.f32 %v1175_v56, %v3266_v38  ;;  %v1459_v38 = vpop.f32.mrf.mxu1 }
 0x2d9   :  { %v1227_v0 = vpop.f32.mrf.mxu0 }
 0x2da   :  { %v1225_v58 = vadd.f32 %v1224_v61, %v1176_v18 }
 0x2dc   :  { %v1265_v59 = vadd.f32 %v3280_v23, %v1225_v58  ;;  %v2702_v3 = vpop.eup %2701 }
 0x2de   :  { %2703 = vtanh.f32 %v1265_v59 }
 0x2df   :  { %v1178_v2 = vpop.f32.mrf.mxu3 }
 0x2e0   :  { %v1179_v52 = vadd.f32 %v1178_v2, %v3269_v60  ;;  %v1461_v60 = vpop.f32.mrf.mxu1 }
 0x2e1   :  { %v1229_v6 = vpop.f32.mrf.mxu0 }
 0x2e2   :  { %v1228_v5 = vadd.f32 %v1227_v0, %v1179_v52 }
 0x2e4   :  { %v2704_v4 = vpop.eup %2703  ;;  %v1267_v28 = vadd.f32 %v3280_v23, %v1228_v5 }
 0x2e5   :  { %v1315_v10 = vpack.c.bf16 %v2704_v4, %v2702_v3 }
 0x2e6   :  { %2705 = vtanh.f32 %v1267_v28 }
 0x2e7   :  { %v1180_v8 = vpop.f32.mrf.mxu3  ;;  %1537 = vmatmul.bf16.gmra.mxu2 %v1315_v10 }
 0x2e8   :  { %v1181_v27 = vadd.f32 %v1180_v8, %v3274_v1  ;;  %v1464_v14 = vpop.f32.mrf.mxu1  ;;  %v3316_v1 = vld [vmem:[%s3440_s9] ss:$0 sm:$0xff] }
 0x2e9   :  { %v1460_v34 = vadd.f32 %v3316_v1, %v1459_v38  ;;  %v1462_v20 = vadd.f32 %v3316_v1, %v1461_v60  ;;  %v1465_v51 = vadd.f32 %v3316_v1, %v1464_v14 }
 0x2ea   :  { %v1230_v7 = vadd.f32 %v1229_v6, %v1181_v27 }
 0x2ec   :  { %v1269_v45 = vadd.f32 %v3280_v23, %v1230_v7  ;;  %v2706_v46 = vpop.eup %2705 }
 0x2ee   :  { %2707 = vtanh.f32 %v1269_v45 }
 0x2f0   :  { %v1466_v15 = vpop.f32.mrf.mxu1 }
 0x2f1   :  { %v1467_v12 = vadd.f32 %v3316_v1, %v1466_v15 }
 0x2f4   :  { %v2708_v13 = vpop.eup %2707 }
 0x2f5   :  { %v1317_v9 = vpack.c.bf16 %v2708_v13, %v2706_v46 }
 0x2f7   :  { %1542 = vmatmul.bf16.gmra.mxu2 %v1317_v9 }
 0x2f8   :  { %v1469_v23 = vpop.f32.mrf.mxu1 }
 0x2f9   :  { %v1470_v44 = vadd.f32 %v3316_v1, %v1469_v23 }
 0x300   :  { %v1471_v29 = vpop.f32.mrf.mxu1 }
 0x301   :  { %v1472_v48 = vadd.f32 %v3316_v1, %v1471_v29 }
 0x308   :  { %v1474_v43 = vpop.f32.mrf.mxu1 }
 0x309   :  { %v1475_v40 = vadd.f32 %v3316_v1, %v1474_v43 }
 0x30a   :  { %v1508_v17 = vpop.f32.mrf.mxu2 }
 0x30b   :  { %v1509_v19 = vadd.f32 %v1508_v17, %v1460_v34 }
 0x30d   :  { %2709 = vtanh.f32 %v1509_v19 }
 0x310   :  { %v1476_v63 = vpop.f32.mrf.mxu1 }
 0x311   :  { %v1477_v55 = vadd.f32 %v3316_v1, %v1476_v63 }
 0x312   :  { %v1510_v24 = vpop.f32.mrf.mxu2 }
 0x313   :  { %v1511_v25 = vadd.f32 %v1510_v24, %v1462_v20  ;;  %v2710_v26 = vpop.eup %2709 }
 0x315   :  { %2711 = vtanh.f32 %v1511_v25 }
 0x318   :  { %v1479_v50 = vpop.f32.mrf.mxu1 }
 0x319   :  { %v1480_v52 = vadd.f32 %v3316_v1, %v1479_v50 }
 0x31a   :  { %v1513_v37 = vpop.f32.mrf.mxu2 }
 0x31b   :  { %v2712_v47 = vpop.eup %2711  ;;  %v1514_v35 = vadd.f32 %v1513_v37, %v1465_v51 }
 0x31c   :  { %v1564_v33 = vpack.c.bf16 %v2712_v47, %v2710_v26 }
 0x31d   :  { %2713 = vtanh.f32 %v1514_v35 }
 0x31e   :  { %1648 = vmatmul.bf16.vlgmr.msra.gmra.mxu3 %v1564_v33 }
 0x320   :  { %v1481_v56 = vpop.f32.mrf.mxu1 }
 0x321   :  { %v1482_v4 = vadd.f32 %v3316_v1, %v1481_v56 }
 0x322   :  { %v1515_v30 = vpop.f32.mrf.mxu2 }
 0x323   :  { %v1516_v54 = vadd.f32 %v1515_v30, %v1467_v12  ;;  %v2714_v31 = vpop.eup %2713 }
 0x325   :  { %2715 = vtanh.f32 %v1516_v54 }
 0x328   :  { %v1484_v0 = vpop.f32.mrf.mxu1 }
 0x329   :  { %v1485_v7 = vadd.f32 %v3316_v1, %v1484_v0 }
 0x32a   :  { %v1518_v32 = vpop.f32.mrf.mxu2 }
 0x32b   :  { %v2716_v36 = vpop.eup %2715  ;;  %v1519_v42 = vadd.f32 %v1518_v32, %v1470_v44 }
 0x32c   :  { %v1565_v41 = vpack.c.bf16 %v2716_v36, %v2714_v31 }
 0x32d   :  { %2717 = vtanh.f32 %v1519_v42 }
 0x32e   :  { %1653 = vmatmul.bf16.gmra.mxu3 %v1565_v41  ;;  %v3337_v41 = vld [vmem:[%s3442_s11] ss:$0 sm:$0xff]  ;;  %s2988_s11 = smov [#allocation15]  }
 0x330   :  { %v1486_v8 = vpop.f32.mrf.mxu1 }
 0x331   :  { %v1487_v60 = vadd.f32 %v3316_v1, %v1486_v8 }
 0x332   :  { %v1520_v49 = vpop.f32.mrf.mxu2 }
 0x333   :  { %v1521_v21 = vadd.f32 %v1520_v49, %v1472_v48  ;;  %v2718_v22 = vpop.eup %2717 }
 0x335   :  { %2719 = vtanh.f32 %v1521_v21 }
 0x338   :  { %v1489_v45 = vpop.f32.mrf.mxu1 }
 0x339   :  { %v1490_v23 = vadd.f32 %v3316_v1, %v1489_v45 }
 0x33a   :  { %v1523_v11 = vpop.f32.mrf.mxu2 }
 0x33b   :  { %v2720_v39 = vpop.eup %2719  ;;  %v1524_v61 = vadd.f32 %v1523_v11, %v1475_v40 }
 0x33c   :  { %v1566_v53 = vpack.c.bf16 %v2720_v39, %v2718_v22 }
 0x33d   :  { %2721 = vtanh.f32 %v1524_v61 }
 0x33e   :  { %1658 = vmatmul.bf16.gmra.mxu3 %v1566_v53 }
 0x340   :  { %v1491_v14 = vpop.f32.mrf.mxu1 }
 0x341   :  { %v1492_v20 = vadd.f32 %v3316_v1, %v1491_v14 }
 0x342   :  { %v1525_v18 = vpop.f32.mrf.mxu2 }
 0x343   :  { %v1526_v57 = vadd.f32 %v1525_v18, %v1477_v55  ;;  %v2722_v58 = vpop.eup %2721 }
 0x345   :  { %2723 = vtanh.f32 %v1526_v57 }
 0x348   :  { %v1494_v26 = vpop.f32.mrf.mxu1 }
 0x349   :  { %v1495_v51 = vadd.f32 %v3316_v1, %v1494_v26 }
 0x34a   :  { %v1528_v59 = vpop.f32.mrf.mxu2 }
 0x34b   :  { %v2724_v62 = vpop.eup %2723  ;;  %v1529_v3 = vadd.f32 %v1528_v59, %v1480_v52 }
 0x34c   :  { %v1567_v2 = vpack.c.bf16 %v2724_v62, %v2722_v58 }
 0x34d   :  { %2725 = vtanh.f32 %v1529_v3 }
 0x34e   :  { %1663 = vmatmul.bf16.gmra.mxu3 %v1567_v2 }
 0x350   :  { %v1496_v35 = vpop.f32.mrf.mxu1 }
 0x351   :  { %v1497_v30 = vadd.f32 %v3316_v1, %v1496_v35  ;;  %v3343_v1 = vld [vmem:[%s3443_s12] ss:$0 sm:$0xff]  ;;  %s1967_s12 = sshll.u32 %s2988_s11, 4  ;;  %s1968_s12 = int_to_ptr.vmem [resolvable:$true] %s1967_s12 }
 0x352   :  { %v1530_v5 = vpop.f32.mrf.mxu2 }
 0x353   :  { %v1531_v10 = vadd.f32 %v1530_v5, %v1482_v4  ;;  %v2726_v38 = vpop.eup %2725 }
 0x355   :  { %2727 = vtanh.f32 %v1531_v10 }
 0x35a   :  { %v1533_v27 = vpop.f32.mrf.mxu2 }
 0x35b   :  { %v2728_v28 = vpop.eup %2727  ;;  %v1534_v16 = vadd.f32 %v1533_v27, %v1485_v7 }
 0x35c   :  { %v1568_v6 = vpack.c.bf16 %v2728_v28, %v2726_v38 }
 0x35d   :  { %2729 = vtanh.f32 %v1534_v16 }
 0x35e   :  { %1668 = vmatmul.bf16.gmra.mxu3 %v1568_v6 }
 0x362   :  { %v1535_v46 = vpop.f32.mrf.mxu2 }
 0x363   :  { %v1536_v13 = vadd.f32 %v1535_v46, %v1487_v60  ;;  %v2730_v9 = vpop.eup %2729 }
 0x365   :  { %2731 = vtanh.f32 %v1536_v13 }
 0x36a   :  { %v1538_v15 = vpop.f32.mrf.mxu2 }
 0x36b   :  { %v2732_v17 = vpop.eup %2731  ;;  %v1539_v19 = vadd.f32 %v1538_v15, %v1490_v23 }
 0x36c   :  { %v1569_v34 = vpack.c.bf16 %v2732_v17, %v2730_v9 }
 0x36d   :  { %2733 = vtanh.f32 %v1539_v19 }
 0x36e   :  { %1673 = vmatmul.bf16.gmra.mxu3 %v1569_v34 }
 0x372   :  { %v1540_v24 = vpop.f32.mrf.mxu2 }
 0x373   :  { %v1541_v25 = vadd.f32 %v1540_v24, %v1492_v20  ;;  %v2734_v29 = vpop.eup %2733 }
 0x375   :  { %2735 = vtanh.f32 %v1541_v25 }
 0x37a   :  { %v1543_v37 = vpop.f32.mrf.mxu2 }
 0x37b   :  { %v2736_v47 = vpop.eup %2735  ;;  %v1544_v12 = vadd.f32 %v1543_v37, %v1495_v51  ;;  %v2986_v51 = vmov 0  }
 0x37c   :  { %v1570_v33 = vpack.c.bf16 %v2736_v47, %v2734_v29  ;;  %2572 = vset.pattern.permute.xlu1 %v2986_v51  ;;  %2573 = vset.pattern.permute.xlu2 %v2986_v51 }
 0x37d   :  { %2737 = vtanh.f32 %v1544_v12  ;;  %2574 = vset.pattern.permute.xlu0 %v2986_v51 }
 0x37e   :  { %1678 = vmatmul.bf16.gmra.mxu3 %v1570_v33 }
 0x382   :  { %v1545_v54 = vpop.f32.mrf.mxu2 }
 0x383   :  { %v1546_v43 = vadd.f32 %v1545_v54, %v1497_v30  ;;  %v2738_v31 = vpop.eup %2737 }
 0x385   :  { %2739 = vtanh.f32 %v1546_v43 }
 0x38b   :  { %v2740_v32 = vpop.eup %2739 }
 0x38c   :  { %v1571_v36 = vpack.c.bf16 %v2740_v32, %v2738_v31 }
 0x38e   :  { %1683 = vmatmul.bf16.gmra.mxu3 %v1571_v36 }
 0x3a1   :  { %v1649_v44 = vpop.f32.mrf.mxu3 }
 0x3a2   :  { %v1650_v63 = vadd.f32 %v3337_v41, %v1649_v44 }
 0x3a4   :  { %2741 = vtanh.f32 %v1650_v63 }
 0x3a9   :  { %v1651_v42 = vpop.f32.mrf.mxu3 }
 0x3aa   :  { %v2742_v48 = vpop.eup %2741  ;;  %v1652_v49 = vadd.f32 %v3337_v41, %v1651_v42 }
 0x3ab   :  { %v1709_v21 = vmul.f32 %v2742_v48, %v3343_v1 }
 0x3ac   :  { %2743 = vtanh.f32 %v1652_v49  ;;  %v2580_v49 = vld [vmem:[#allocation2] ss:$0 sm:$0xff] }
 0x3ad   :  { %1725 = vadd.xlane.f32.xlu0 %v1709_v21 }
 0x3b1   :  { %v1654_v50 = vpop.f32.mrf.mxu3 }
 0x3b2   :  { %v2744_v22 = vpop.eup %2743  ;;  %v1655_v11 = vadd.f32 %v3337_v41, %v1654_v50 }
 0x3b3   :  { %v1710_v39 = vmul.f32 %v2744_v22, %v3343_v1 }
 0x3b4   :  { %2745 = vtanh.f32 %v1655_v11 }
 0x3b5   :  { %1727 = vadd.xlane.f32.xlu0 %v1710_v39 }
 0x3b9   :  { %v1656_v53 = vpop.f32.mrf.mxu3 }
 0x3ba   :  { %v2746_v40 = vpop.eup %2745  ;;  %v1657_v61 = vadd.f32 %v3337_v41, %v1656_v53 }
 0x3bb   :  { %v1711_v55 = vmul.f32 %v2746_v40, %v3343_v1 }
 0x3bc   :  { %2747 = vtanh.f32 %v1657_v61 }
 0x3bd   :  { %1729 = vadd.xlane.f32.xlu1 %v1711_v55 }
 0x3c1   :  { %v1659_v56 = vpop.f32.mrf.mxu3 }
 0x3c2   :  { %v2748_v18 = vpop.eup %2747  ;;  %v1660_v57 = vadd.f32 %v3337_v41, %v1659_v56 }
 0x3c3   :  { %v1712_v58 = vmul.f32 %v2748_v18, %v3343_v1 }
 0x3c4   :  { %2749 = vtanh.f32 %v1660_v57 }
 0x3c5   :  { %1731 = vadd.xlane.f32.xlu1 %v1712_v58 }
 0x3c9   :  { %v1661_v59 = vpop.f32.mrf.mxu3 }
 0x3ca   :  { %v2750_v62 = vpop.eup %2749  ;;  %v1662_v0 = vadd.f32 %v3337_v41, %v1661_v59 }
 0x3cb   :  { %v1713_v2 = vmul.f32 %v2750_v62, %v3343_v1 }
 0x3cc   :  { %2751 = vtanh.f32 %v1662_v0 }
 0x3cd   :  { %1733 = vadd.xlane.f32.xlu2 %v1713_v2 }
 0x3d1   :  { %v1664_v52 = vpop.f32.mrf.mxu3 }
 0x3d2   :  { %v2752_v3 = vpop.eup %2751  ;;  %v1665_v4 = vadd.f32 %v3337_v41, %v1664_v52 }
 0x3d3   :  { %v1714_v5 = vmul.f32 %v2752_v3, %v3343_v1 }
 0x3d4   :  { %2753 = vtanh.f32 %v1665_v4 }
 0x3d5   :  { %1735 = vadd.xlane.f32.xlu2 %v1714_v5 }
 0x3d9   :  { %v1666_v10 = vpop.f32.mrf.mxu3 }
 0x3da   :  { %v2754_v8 = vpop.eup %2753  ;;  %v1667_v38 = vadd.f32 %v3337_v41, %v1666_v10 }
 0x3db   :  { %v1715_v27 = vmul.f32 %v2754_v8, %v3343_v1 }
 0x3dc   :  { %2755 = vtanh.f32 %v1667_v38 }
 0x3dd   :  { %1737 = vadd.xlane.f32.xlu0 %v1715_v27 }
 0x3e1   :  { %v1669_v28 = vpop.f32.mrf.mxu3 }
 0x3e2   :  { %v2756_v6 = vpop.eup %2755  ;;  %v1670_v7 = vadd.f32 %v3337_v41, %v1669_v28 }
 0x3e3   :  { %v1716_v45 = vmul.f32 %v2756_v6, %v3343_v1 }
 0x3e4   :  { %2757 = vtanh.f32 %v1670_v7 }
 0x3e5   :  { %1739 = vadd.xlane.f32.xlu1 %v1716_v45 }
 0x3e9   :  { %v1671_v16 = vpop.f32.mrf.mxu3 }
 0x3ea   :  { %v2758_v60 = vpop.eup %2757  ;;  %v1672_v46 = vadd.f32 %v3337_v41, %v1671_v16  ;;  %v1777_v16 = vlaneseq }
 0x3eb   :  { %v1717_v13 = vmul.f32 %v2758_v60, %v3343_v1 }
 0x3ec   :  { %2759 = vtanh.f32 %v1672_v46  ;;  %v3376_v60 = vshrl.u32 %v1777_v16, 7 }
 0x3ed   :  { %1741 = vadd.xlane.f32.xlu2 %v1717_v13 }
 0x3ee   :  { %v1779_v13 = vadd.s32 8, %v3376_v60 }
 0x3f1   :  { %v1674_v9 = vpop.f32.mrf.mxu3 }
 0x3f2   :  { %v2760_v14 = vpop.eup %2759  ;;  %v1675_v15 = vadd.f32 %v3337_v41, %v1674_v9  ;;  %v3379_v9 = vand.u32 127, %v1777_v16 }
 0x3f3   :  { %v1718_v17 = vmul.f32 %v2760_v14, %v3343_v1  ;;  %v1780_v14 = vadd.s32 16, %v3376_v60 }
 0x3f4   :  { %2761 = vtanh.f32 %v1675_v15  ;;  %vm1796_vm0 = vcmp.eq.s32.totalorder %v3376_v60, %v3379_v9  ;;  %vm1797_vm1 = vcmp.eq.s32.totalorder %v1779_v13, %v3379_v9 }
 0x3f5   :  { %1743 = vadd.xlane.f32.xlu0 %v1718_v17  ;;  %vm1798_vm2 = vcmp.eq.s32.totalorder %v1780_v14, %v3379_v9  ;;  %v2987_v17 = vmov 0.0   ;;  %v1793_v14 = vadd.s32 120, %v3376_v60 }
 0x3f7   :  { %vm1811_vm15 = vcmp.eq.s32.totalorder %v1793_v14, %v3379_v9 }
 0x3f9   :  { %v1676_v34 = vpop.f32.mrf.mxu3 }
 0x3fa   :  { %v2762_v23 = vpop.eup %2761  ;;  %v1677_v19 = vadd.f32 %v3337_v41, %v1676_v34  ;;  %v2430_v34 = vsel %vm1796_vm0, 1.0, %v2987_v17 }
 0x3fb   :  { %v1719_v20 = vmul.f32 %v2762_v23, %v3343_v1  ;;  %v1781_v23 = vadd.s32 24, %v3376_v60 }
 0x3fc   :  { %2763 = vtanh.f32 %v1677_v19  ;;  %v1782_v19 = vadd.s32 32, %v3376_v60 }
 0x3fd   :  { %1745 = vadd.xlane.f32.xlu1 %v1719_v20  ;;  %v2431_v20 = vsel %vm1797_vm1, 1.0, %v2987_v17  ;;  %vm1799_vm3 = vcmp.eq.s32.totalorder %v1781_v23, %v3379_v9 }
 0x3fe   :  { %vm1800_vm4 = vcmp.eq.s32.totalorder %v1782_v19, %v3379_v9 }
 0x401   :  { %v1679_v24 = vpop.f32.mrf.mxu3 }
 0x402   :  { %v2764_v25 = vpop.eup %2763  ;;  %v1680_v26 = vadd.f32 %v3337_v41, %v1679_v24 }
 0x403   :  { %v1720_v29 = vmul.f32 %v2764_v25, %v3343_v1  ;;  %v2432_v25 = vsel %vm1798_vm2, 1.0, %v2987_v17 }
 0x404   :  { %2765 = vtanh.f32 %v1680_v26 }
 0x405   :  { %1747 = vadd.xlane.f32.xlu2 %v1720_v29 }
 0x409   :  { %v1681_v37 = vpop.f32.mrf.mxu3 }
 0x40a   :  { %v2766_v47 = vpop.eup %2765  ;;  %v1682_v33 = vadd.f32 %v3337_v41, %v1681_v37 }
 0x40b   :  { %v1721_v35 = vmul.f32 %v2766_v47, %v3343_v1 }
 0x40c   :  { %2767 = vtanh.f32 %v1682_v33 }
 0x40d   :  { %1749 = vadd.xlane.f32.xlu0 %v1721_v35  ;;  %v1783_v35 = vadd.s32 40, %v3376_v60 }
 0x40f   :  { %vm1801_vm5 = vcmp.eq.s32.totalorder %v1783_v35, %v3379_v9 }
 0x411   :  { %v1684_v12 = vpop.f32.mrf.mxu3 }
 0x412   :  { %v2768_v30 = vpop.eup %2767  ;;  %v1685_v54 = vadd.f32 %v3337_v41, %v1684_v12  ;;  %v1784_v12 = vadd.s32 48, %v3376_v60 }
 0x413   :  { %v1722_v43 = vmul.f32 %v2768_v30, %v3343_v1  ;;  %v2433_v30 = vsel %vm1799_vm3, 1.0, %v2987_v17 }
 0x414   :  { %2769 = vtanh.f32 %v1685_v54  ;;  %v2434_v54 = vsel %vm1800_vm4, 1.0, %v2987_v17  ;;  %vm1802_vm6 = vcmp.eq.s32.totalorder %v1784_v12, %v3379_v9 }
 0x415   :  { %1751 = vadd.xlane.f32.xlu1 %v1722_v43 }
 0x419   :  { %v1686_v31 = vpop.f32.mrf.mxu3 }
 0x41a   :  { %v2770_v32 = vpop.eup %2769  ;;  %v1687_v36 = vadd.f32 %v3337_v41, %v1686_v31 }
 0x41b   :  { %v1723_v44 = vmul.f32 %v2770_v32, %v3343_v1 }
 0x41c   :  { %2771 = vtanh.f32 %v1687_v36 }
 0x41d   :  { %1753 = vadd.xlane.f32.xlu2 %v1723_v44 }
 0x420   :  { %v1726_v48 = vpop.xlane.xlu0 %1725 }
 0x421   :  { %v1761_v21 = vadd.f32 %v2580_v49, %v1726_v48  ;;  %v1786_v48 = vadd.s32 64, %v3376_v60 }
 0x422   :  { %v2772_v63 = vpop.eup %2771 }
 0x423   :  { %v1724_v42 = vmul.f32 %v2772_v63, %v3343_v1  ;;  %vm1804_vm8 = vcmp.eq.s32.totalorder %v1786_v48, %v3379_v9 }
 0x425   :  { %1755 = vadd.xlane.f32.xlu0 %v1724_v42  ;;  %v1785_v42 = vadd.s32 56, %v3376_v60 }
 0x427   :  { %vm1803_vm7 = vcmp.eq.s32.totalorder %v1785_v42, %v3379_v9 }
 0x428   :  { %v1728_v50 = vpop.xlane.xlu0 %1727 }
 0x429   :  { %v1762_v11 = vadd.f32 %v2580_v49, %v1728_v50 }
 0x42e   :  { %1846 = vperm.xlu1 %2572, %v1761_v21   ;;  %v2436_v21 = vsel %vm1802_vm6, 1.0, %v2987_v17 }
 0x430   :  { %v1730_v22 = vpop.xlane.xlu1 %1729 }
 0x431   :  { %v1763_v39 = vadd.f32 %v2580_v49, %v1730_v22  ;;  %v1787_v22 = vadd.s32 72, %v3376_v60 }
 0x433   :  { %vm1805_vm9 = vcmp.eq.s32.totalorder %v1787_v22, %v3379_v9 }
 0x435   :  { %1851 = vperm.xlu2 %2573, %v1762_v11  }
 0x438   :  { %v1732_v53 = vpop.xlane.xlu1 %1731 }
 0x439   :  { %1856 = vperm.xlu0 %2574, %v1763_v39   ;;  %v1764_v41 = vadd.f32 %v2580_v49, %v1732_v53 }
 0x43d   :  { %1861 = vperm.xlu2 %2573, %v1764_v41   ;;  %v2437_v41 = vsel %vm1803_vm7, 1.0, %v2987_v17 }
 0x440   :  { %v1734_v40 = vpop.xlane.xlu2 %1733 }
 0x441   :  { %v1765_v61 = vadd.f32 %v2580_v49, %v1734_v40 }
 0x443   :  { %1866 = vperm.xlu1 %2572, %v1765_v61   ;;  %v2438_v61 = vsel %vm1804_vm8, 1.0, %v2987_v17 }
 0x448   :  { %v1736_v55 = vpop.xlane.xlu2 %1735 }
 0x449   :  { %v1766_v56 = vadd.f32 %v2580_v49, %v1736_v55 }
 0x44b   :  { %1871 = vperm.xlu2 %2573, %v1766_v56  }
 0x450   :  { %v1738_v1 = vpop.xlane.xlu0 %1737 }
 0x451   :  { %v1767_v18 = vadd.f32 %v2580_v49, %v1738_v1  ;;  %v1788_v1 = vadd.s32 80, %v3376_v60 }
 0x453   :  { %1876 = vperm.xlu1 %2572, %v1767_v18   ;;  %v1789_v18 = vadd.s32 88, %v3376_v60  ;;  %vm1806_vm10 = vcmp.eq.s32.totalorder %v1788_v1, %v3379_v9 }
 0x455   :  { %vm1807_vm11 = vcmp.eq.s32.totalorder %v1789_v18, %v3379_v9 }
 0x458   :  { %v1740_v57 = vpop.xlane.xlu1 %1739 }
 0x459   :  { %v1768_v58 = vadd.f32 %v2580_v49, %v1740_v57  ;;  %v2439_v57 = vsel %vm1805_vm9, 1.0, %v2987_v17 }
 0x45b   :  { %1881 = vperm.xlu2 %2573, %v1768_v58  }
 0x460   :  { %v1742_v59 = vpop.xlane.xlu2 %1741 }
 0x461   :  { %v1769_v62 = vadd.f32 %v2580_v49, %v1742_v59 }
 0x463   :  { %1886 = vperm.xlu1 %2572, %v1769_v62  }
 0x468   :  { %v1744_v0 = vpop.xlane.xlu0 %1743 }
 0x469   :  { %v1770_v2 = vadd.f32 %v2580_v49, %v1744_v0  ;;  %v1790_v0 = vadd.s32 96, %v3376_v60 }
 0x46b   :  { %1891 = vperm.xlu0 %2574, %v1770_v2   ;;  %vm1808_vm12 = vcmp.eq.s32.totalorder %v1790_v0, %v3379_v9 }
 0x470   :  { %v1746_v52 = vpop.xlane.xlu1 %1745 }
 0x471   :  { %v1771_v3 = vadd.f32 %v2580_v49, %v1746_v52 }
 0x473   :  { %1896 = vperm.xlu2 %2573, %v1771_v3  }
 0x478   :  { %v1748_v4 = vpop.xlane.xlu2 %1747 }
 0x479   :  { %v1772_v5 = vadd.f32 %v2580_v49, %v1748_v4  ;;  %v2440_v4 = vsel %vm1806_vm10, 1.0, %v2987_v17 }
 0x47b   :  { %1901 = vperm.xlu1 %2572, %v1772_v5  }
 0x480   :  { %v1750_v10 = vpop.xlane.xlu0 %1749 }
 0x481   :  { %v1773_v8 = vadd.f32 %v2580_v49, %v1750_v10  ;;  %v1791_v10 = vadd.s32 104, %v3376_v60 }
 0x483   :  { %1906 = vperm.xlu0 %2574, %v1773_v8   ;;  %v2441_v8 = vsel %vm1807_vm11, 1.0, %v2987_v17  ;;  %vm1809_vm13 = vcmp.eq.s32.totalorder %v1791_v10, %v3379_v9 }
 0x488   :  { %v1752_v38 = vpop.xlane.xlu1 %1751 }
 0x489   :  { %v1774_v27 = vadd.f32 %v2580_v49, %v1752_v38 }
 0x48b   :  { %1911 = vperm.xlu2 %2573, %v1774_v27  }
 0x490   :  { %v1754_v28 = vpop.xlane.xlu2 %1753 }
 0x491   :  { %v1775_v6 = vadd.f32 %v2580_v49, %v1754_v28  ;;  %v1792_v28 = vadd.s32 112, %v3376_v60 }
 0x493   :  { %1916 = vperm.xlu1 %2572, %v1775_v6   ;;  %v2442_v6 = vsel %vm1808_vm12, 1.0, %v2987_v17  ;;  %vm1810_vm14 = vcmp.eq.s32.totalorder %v1792_v28, %v3379_v9 }
 0x494   :  { %v2444_v19 = vsel %vm1810_vm14, 1.0, %v2987_v17 }
 0x498   :  { %v1756_v7 = vpop.xlane.xlu0 %1755  ;;  %v1852_v46 = vpop.permute.xlu2 %1851 }
 0x499   :  { %v1776_v45 = vadd.f32 %v2580_v49, %v1756_v7  ;;  %v1925_v47 = vmul.f32 %v2431_v20, %v1852_v46  ;;  %v2435_v49 = vsel %vm1801_vm5, 1.0, %v2987_v17 }
 0x49b   :  { %1921 = vperm.xlu0 %2574, %v1776_v45  }
 0x4a0   :  { %v1847_v15 = vpop.permute.xlu1 %1846  ;;  %v1862_v24 = vpop.permute.xlu2 %1861 }
 0x4a1   :  { %v1924_v29 = vmul.f32 %v2430_v34, %v1847_v15  ;;  %v1927_v31 = vmul.f32 %v2433_v30, %v1862_v24  ;;  %v2443_v34 = vsel %vm1809_vm13, 1.0, %v2987_v17 }
 0x4a3   :  { %v1940_v51 = vadd.f32 %v1925_v47, %v1924_v29  ;;  %v2445_v29 = vsel %vm1811_vm15, 1.0, %v2987_v17 }
 0x4a8   :  { %v1872_v36 = vpop.permute.xlu2 %1871 }
 0x4a9   :  { %v1929_v11 = vmul.f32 %v2435_v49, %v1872_v36 }
 0x4ab   :  { %v1857_v26 = vpop.permute.xlu0 %1856 }
 0x4ac   :  { %v1926_v33 = vmul.f32 %v2432_v25, %v1857_v26 }
 0x4ae   :  { %v1941_v43 = vadd.f32 %v1940_v51, %v1926_v33 }
 0x4b0   :  { %v1942_v63 = vadd.f32 %v1941_v43, %v1927_v31 }
 0x4b5   :  { %v1867_v37 = vpop.permute.xlu1 %1866  ;;  %v1882_v40 = vpop.permute.xlu2 %1881 }
 0x4b6   :  { %v1928_v32 = vmul.f32 %v2434_v54, %v1867_v37  ;;  %v1931_v59 = vmul.f32 %v2437_v41, %v1882_v40 }
 0x4b8   :  { %v1943_v50 = vadd.f32 %v1942_v63, %v1928_v32 }
 0x4ba   :  { %v1944_v53 = vadd.f32 %v1943_v50, %v1929_v11 }
 0x4c5   :  { %v1877_v44 = vpop.permute.xlu1 %1876 }
 0x4c6   :  { %v1930_v39 = vmul.f32 %v2436_v21, %v1877_v44 }
 0x4c8   :  { %v1945_v56 = vadd.f32 %v1944_v53, %v1930_v39 }
 0x4ca   :  { %v1946_v2 = vadd.f32 %v1945_v56, %v1931_v59 }
 0x4cd   :  { %v1897_v5 = vpop.permute.xlu2 %1896 }
 0x4ce   :  { %v1934_v45 = vmul.f32 %v2440_v4, %v1897_v5 }
 0x4d5   :  { %v1887_v55 = vpop.permute.xlu1 %1886 }
 0x4d6   :  { %v1932_v62 = vmul.f32 %v2438_v61, %v1887_v55 }
 0x4d8   :  { %v1947_v3 = vadd.f32 %v1946_v2, %v1932_v62 }
 0x4dd   :  { %v1892_v58 = vpop.permute.xlu0 %1891 }
 0x4de   :  { %v1933_v52 = vmul.f32 %v2439_v57, %v1892_v58 }
 0x4e0   :  { %v1948_v27 = vadd.f32 %v1947_v3, %v1933_v52 }
 0x4e2   :  { %v1949_v46 = vadd.f32 %v1948_v27, %v1934_v45 }
 0x4e5   :  { %v1912_v23 = vpop.permute.xlu2 %1911 }
 0x4e6   :  { %v1937_v25 = vmul.f32 %v2443_v34, %v1912_v23 }
 0x4ed   :  { %v1902_v38 = vpop.permute.xlu1 %1901 }
 0x4ee   :  { %v1935_v16 = vmul.f32 %v2441_v8, %v1902_v38 }
 0x4f0   :  { %v1950_v15 = vadd.f32 %v1949_v46, %v1935_v16 }
 0x4f5   :  { %v1907_v7 = vpop.permute.xlu0 %1906 }
 0x4f6   :  { %v1936_v13 = vmul.f32 %v2442_v6, %v1907_v7 }
 0x4f8   :  { %v1951_v24 = vadd.f32 %v1950_v15, %v1936_v13 }
 0x4fa   :  { %v1952_v37 = vadd.f32 %v1951_v24, %v1937_v25 }
 0x505   :  { %v1917_v20 = vpop.permute.xlu1 %1916 }
 0x506   :  { %v1938_v26 = vmul.f32 %v2444_v19, %v1917_v20 }
 0x508   :  { %v1953_v33 = vadd.f32 %v1952_v37, %v1938_v26 }
 0x50d   :  { %v1922_v47 = vpop.permute.xlu0 %1921 }
 0x50e   :  { %v1939_v51 = vmul.f32 %v2445_v29, %v1922_v47 }
 0x510   :  { %v1954_v35 = vadd.f32 %v1953_v33, %v1939_v51 }
 0x512   :  { %v1955_v60 = vrot.slane %v1954_v35, 4 }
 0x514   :  { %v1956_v12 = vadd.f32 %v1955_v60, %v1954_v35 }
 0x516   :  { %v1957_v30 = vrot.slane %v1956_v12, 2 }
 0x518   :  { %v1958_v54 = vadd.f32 %v1957_v30, %v1956_v12 }
 0x51a   :  { %v1959_v9 = vrot.slane %v1958_v54, 1 }
 0x51c   :  { %v1960_v43 = vadd.f32 %v1959_v9, %v1958_v54 }
 0x51e   :  { %1961 = vst [vmem:[#allocation15] sm:$0x1] %v1960_v43 }
 0x51f   :  { %1972 = dma.vmem_to_hbm [thread:$0]  %s1968_s12, 16, %s1970_s13, [#allocation5]  }
 0x520   :  { %2973 = dma.done.wait [#allocation5], 16  }
 0x521   :  { %2974 = vsyncadd [#allocation5], 4294967280 }
 0x522   :  { %1977 = vsyncpa [#allocation4], 1 }
 0x523   :  { %1978 = vsyncpa [#allocation7], 1 }
 0x524   :  { %1979 = vsyncpa [#allocation10], 1 }
 0x525   :  { %1980 = vsyncpa [#allocation13], 1 }
 0x526   :  { %1981 = vsyncpa [#allocation5], 1 }

</bundles_post_ra>
